<compile_context>
chip_gen: v6e
topology: v6e:2x2x1
jax: 0.10.0
libtpu: 0.0.40
codegen_flags: <defaults>
</compile_context>

<pallas_src>
import math

import jax
import jax.numpy as jnp
from jax.experimental import pallas as pl
from jax.experimental.pallas import tpu as pltpu


_LANES = 512                     # lane-dense last dim (multiple of 128)
_MAX_ROWS_ONCHIP = 2048          # 4 MiB/block; 2 streams x 2 bufs = 16 MiB VMEM
_MAX_ROWS_STREAMED = 1024        # 2 MiB/block; 3 streams x 2 bufs = 12 MiB VMEM
_MIN_BLOCK_ROWS = 128            # keep per-step overhead (~0.35us) amortized
_TARGET_GRID_STEPS = 16          # >= ~8 steps per TensorCore on v7x (2 TCs)
_FAST_PATH_MAX_ELEMS = 1 << 18   # < 1 MiB f32: plain jnp beats kernel overhead
_VMEM_LIMIT = 32 * 1024 * 1024   # explicit; safe on v5e / v6e / v7x


# ----------------------------------------------------------------------------
# Kernels
# ----------------------------------------------------------------------------
def _gauss_box_muller(shape):
    """Standard-normal draw of `shape` from the (already seeded) on-chip PRNG.

    Only bit ops + log/sqrt/cos; two 32-bit draws per element.
    """
    def uniform01(s):
        bits = pltpu.prng_random_bits(s)
        if bits.dtype != jnp.int32:
            bits = pltpu.bitcast(bits, jnp.int32)
        # 23 random mantissa bits -> float32 in [1, 2), minus 1 -> [0, 1).
        mant = (bits & 0x007FFFFF) | 0x3F800000
        return pltpu.bitcast(mant, jnp.float32) - 1.0

    u1 = 1.0 - uniform01(shape)            # (0, 1]  -- safe for log
    u2 = uniform01(shape)                  # [0, 1)
    r = jnp.sqrt(-2.0 * jnp.log(u1))
    return r * jnp.cos((2.0 * math.pi) * u2)


def _make_onchip_kernel(use_stateful):
    def kernel(seed_ref, scale_ref, x_ref, o_ref):
        # Independent stream per grid tile (safe with "parallel" semantics).
        pltpu.prng_seed(seed_ref[0], pl.program_id(0))
        if use_stateful:
            g = pltpu.stateful_normal(x_ref.shape, jnp.float32)
        else:
            g = _gauss_box_muller(x_ref.shape)
        # x + x * (g * scale)  ==  x * (1 + scale * g)
        o_ref[...] = (x_ref[...] * (1.0 + scale_ref[0] * g)).astype(o_ref.dtype)
    return kernel


_ONCHIP_KERNELS = (
    ("stateful_normal", _make_onchip_kernel(True)),
    ("box_muller", _make_onchip_kernel(False)),
)


def _streamed_kernel(scale_ref, x_ref, g_ref, o_ref):
    # Fallback: Gaussian streamed in from HBM (previous, proven path).
    o_ref[...] = (x_ref[...] * (1.0 + scale_ref[0] * g_ref[...])).astype(o_ref.dtype)


# ----------------------------------------------------------------------------
# Launch helpers
# ----------------------------------------------------------------------------
def _launch(kernel, scalar_args, tensor_args, block_rows):
    rows, lanes = tensor_args[0].shape
    grid = (pl.cdiv(rows, block_rows),)          # ragged final block is masked
    smem_spec = pl.BlockSpec(memory_space=pltpu.MemorySpace.SMEM)
    tile_spec = pl.BlockSpec((block_rows, lanes), lambda i: (i, 0))
    return pl.pallas_call(
        kernel,
        out_shape=jax.ShapeDtypeStruct((rows, lanes), tensor_args[0].dtype),
        grid=grid,
        in_specs=[smem_spec] * len(scalar_args) + [tile_spec] * len(tensor_args),
        out_specs=tile_spec,
        compiler_params=pltpu.CompilerParams(
            dimension_semantics=("parallel",),   # shard grid across v7x's 2 TCs
            vmem_limit_bytes=_VMEM_LIMIT,
        ),
    )(*scalar_args, *tensor_args)


def _choose_block_rows(rows, max_rows):
    if rows <= 8:
        return rows                               # single full-array block
    rows8 = ((rows + 7) // 8) * 8
    target = ((pl.cdiv(rows, _TARGET_GRID_STEPS) + 7) // 8) * 8
    return min(max_rows, rows8, max(_MIN_BLOCK_ROWS, target))


_ONCHIP_PROBED = False
_ONCHIP_KERNEL = None


def _pick_onchip_kernel():
    """One-time probe: which on-chip RNG path compiles & produces sane noise."""
    global _ONCHIP_PROBED, _ONCHIP_KERNEL
    if not _ONCHIP_PROBED:
        _ONCHIP_PROBED = True
        x = jnp.ones((8, _LANES), jnp.float32)
        seed = jnp.array([1234], jnp.int32)
        one = jnp.array([1.0], jnp.float32)
        for _, kern in _ONCHIP_KERNELS:
            try:
                g = jax.block_until_ready(_launch(kern, (seed, one), (x,), 8)) - 1.0
                ok = (bool(jnp.all(jnp.isfinite(g)))
                      and abs(float(jnp.mean(g))) < 0.5
                      and 0.5 < float(jnp.std(g)) < 2.0)
            except Exception:
                ok = False
            if ok:
                _ONCHIP_KERNEL = kern
                break
    return _ONCHIP_KERNEL


# ----------------------------------------------------------------------------
# Public forward
# ----------------------------------------------------------------------------
def noise_forward(x, noise_param, key, *, fast_path_max_elems=_FAST_PATH_MAX_ELEMS):
    """Forward pass of `Noise`: x + x * (randn_like(x) * noise_param).

    x:           float32 array of any shape (e.g. NCHW).
    noise_param: scalar / (1,) float32 learnable scale (0.01 at init).
    key:         JAX PRNG key; pass a fresh key per call for fresh noise.
    """
    orig_shape = x.shape
    total = x.size
    scale = jnp.asarray(noise_param, jnp.float32).reshape(1)

    # Tiny tensors: launch/pad overhead dwarfs the work -- let XLA fuse it.
    if total <= fast_path_max_elems:
        g = jax.random.normal(key, x.shape, dtype=x.dtype)
        return x * (1.0 + scale[0] * g)

    # Lane-dense 2-D view (rows, 512). Only the flat tail is padded to a lane
    # multiple (no-op for typical power-of-2 NCHW sizes); the row axis stays
    # ragged and is masked by Pallas in the final block.
    rows = pl.cdiv(total, _LANES)
    pad = rows * _LANES - total
    flat = x.reshape(-1)
    if pad:
        flat = jnp.pad(flat, (0, pad))
    x2 = flat.reshape(rows, _LANES)

    onchip = _pick_onchip_kernel()
    if onchip is not None:
        # Gaussian generated on-chip: kernel HBM traffic is just x-in / o-out.
        block_rows = _choose_block_rows(rows, _MAX_ROWS_ONCHIP)
        seed = jax.random.randint(key, (1,), 0, jnp.iinfo(jnp.int32).max,
                                  dtype=jnp.int32)
        out2 = _launch(onchip, (seed, scale), (x2,), block_rows)
    else:
        # Fallback: stream jax.random.normal noise through the kernel.
        block_rows = _choose_block_rows(rows, _MAX_ROWS_STREAMED)
        g2 = jax.random.normal(key, (rows, _LANES), dtype=x2.dtype)
        out2 = _launch(_streamed_kernel, (scale,), (x2, g2), block_rows)

    if pad:
        return out2.reshape(-1)[:total].reshape(orig_shape)
    return out2.reshape(orig_shape)


# ----------------------------------------------------------------------------
# Self-test
# ----------------------------------------------------------------------------
if __name__ == "__main__":
    keys = jax.random.split(jax.random.PRNGKey(0), 6)
    noise_param = jnp.array([0.01], dtype=jnp.float32)   # nn.Parameter([0.01])

    # 1) Kernel path on a small NCHW tensor (forced past the tiny-input fast
    #    path).  Noise is random -> verify statistically.
    x = jax.random.normal(keys[0], (2, 8, 32, 32), dtype=jnp.float32)  # 16384 elems
    out = jax.block_until_ready(
        noise_forward(x, noise_param, keys[1], fast_path_max_elems=0))
    assert out.shape == x.shape
    assert bool(jnp.all(jnp.isfinite(out)))
    g = (out - x) / (x * noise_param[0])      # implied standard-normal draw
    assert abs(float(jnp.mean(g))) < 0.08, float(jnp.mean(g))
    assert 0.9 < float(jnp.std(g)) < 1.1, float(jnp.std(g))
    assert float(jnp.max(jnp.abs(g))) < 7.0, float(jnp.max(jnp.abs(g)))

    # 2) Kernel path on an awkward (non-512-divisible) shape: exercises the
    #    flat-tail pad, ragged final row block, and output slice.
    x_odd = jax.random.normal(keys[2], (2, 3, 17, 19), dtype=jnp.float32)  # 1938
    out_odd = jax.block_until_ready(
        noise_forward(x_odd, noise_param, keys[3], fast_path_max_elems=0))
    assert out_odd.shape == x_odd.shape
    assert bool(jnp.all(jnp.isfinite(out_odd)))
    assert float(jnp.max(jnp.abs(out_odd / x_odd - 1.0))) < 0.07

    # 3) Tiny-input fast path (pure jnp) -- matches the reference formula.
    x_small = jax.random.normal(keys[4], (2, 4, 16, 16), dtype=jnp.float32)
    out_small = jax.block_until_ready(noise_forward(x_small, noise_param, keys[5]))
    gauss = jax.random.normal(keys[5], x_small.shape, dtype=jnp.float32)
    ref_small = x_small * (1.0 + noise_param[0] * gauss)
    assert bool(jnp.allclose(out_small, ref_small, rtol=1e-5, atol=1e-7))

    print("KERNEL_OK")
</pallas_src>

<mosaic_0001>
module attributes {stable_mosaic.version = 11 : i64} {
  func.func @kernel(%arg0: i32, %arg1: memref<1xi32, #tpu.memory_space<smem>>, %arg2: memref<1xf32, #tpu.memory_space<smem>>, %arg3: memref<8x512xf32, #tpu.memory_space<vmem>>, %arg4: memref<8x512xf32, #tpu.memory_space<vmem>>) attributes {dimension_semantics = [#tpu.dimension_semantics<parallel>], iteration_bounds = array<i64: 1>, scalar_prefetch = 0 : i64, scratch_operands = 0 : i64, tpu.core_type = #tpu.core_type<tc>, window_params = [{transform_indices = @transform_0, window_bounds = array<i64: 1>}, {transform_indices = @transform_1, window_bounds = array<i64: 1>}, {transform_indices = @transform_2, window_bounds = array<i64: 8, 512>}, {transform_indices = @transform_3, window_bounds = array<i64: 8, 512>}]} {
    %c0 = arith.constant 0 : index
    %0 = memref.load %arg1[%c0] : memref<1xi32, #tpu.memory_space<smem>>
    "tpu.prng_set_seed_32"(%0, %arg0) : (i32, i32) -> ()
    %c0_i32 = arith.constant 0 : i32
    %c0_i32_0 = arith.constant 0 : i32
    %cst = arith.constant -0.99999994 : f32
    %cst_1 = arith.constant 1.000000e+00 : f32
    %1 = vector.broadcast %cst : f32 to vector<1x1xf32>
    %2 = vector.broadcast %cst_1 : f32 to vector<1x1xf32>
    %3 = "tpu.prng_random_bits"() : () -> vector<8x512xi32>
    %c9_i32 = arith.constant 9 : i32
    %4 = vector.broadcast %c9_i32 : i32 to vector<8x512xi32>
    %5 = arith.shrui %3, %4 : vector<8x512xi32>
    %c1065353216_i32 = arith.constant 1065353216 : i32
    %6 = vector.broadcast %c1065353216_i32 : i32 to vector<8x512xi32>
    %7 = arith.ori %5, %6 : vector<8x512xi32>
    %8 = tpu.bitcast %7 : vector<8x512xi32> -> vector<8x512xf32>
    %cst_2 = arith.constant 1.000000e+00 : f32
    %9 = vector.broadcast %cst_2 : f32 to vector<8x512xf32>
    %10 = arith.subf %8, %9 : vector<8x512xf32>
    %11 = arith.subf %2, %1 : vector<1x1xf32>
    %12 = vector.broadcast %11 : vector<1x1xf32> to vector<8x512xf32>
    %13 = arith.mulf %10, %12 : vector<8x512xf32>
    %14 = vector.broadcast %1 : vector<1x1xf32> to vector<8x512xf32>
    %15 = arith.addf %13, %14 : vector<8x512xf32>
    %16 = vector.broadcast %1 : vector<1x1xf32> to vector<8x512xf32>
    %17 = arith.maximumf %16, %15 : vector<8x512xf32>
    %cst_3 = arith.constant 0.000000e+00 : f32
    %18 = vector.broadcast %cst_3 : f32 to vector<8x512xf32>
    %19 = arith.subf %18, %17 : vector<8x512xf32>
    %20 = arith.mulf %17, %19 : vector<8x512xf32>
    %21 = math.log1p %20 : vector<8x512xf32>
    %cst_4 = arith.constant 0.000000e+00 : f32
    %22 = vector.broadcast %cst_4 : f32 to vector<8x512xf32>
    %23 = arith.subf %22, %21 : vector<8x512xf32>
    %cst_5 = arith.constant 5.000000e+00 : f32
    %24 = vector.broadcast %cst_5 : f32 to vector<8x512xf32>
    %25 = arith.cmpf olt, %23, %24 : vector<8x512xf32>
    %cst_6 = arith.constant 2.500000e+00 : f32
    %26 = vector.broadcast %cst_6 : f32 to vector<8x512xf32>
    %27 = arith.subf %23, %26 : vector<8x512xf32>
    %28 = math.sqrt %23 : vector<8x512xf32>
    %cst_7 = arith.constant 3.000000e+00 : f32
    %29 = vector.broadcast %cst_7 : f32 to vector<8x512xf32>
    %30 = arith.subf %28, %29 : vector<8x512xf32>
    %31 = arith.select %25, %27, %30 : vector<8x512xi1>, vector<8x512xf32>
    %cst_8 = arith.constant 2.81022636E-8 : f32
    %cst_9 = arith.constant -2.00214257E-4 : f32
    %32 = vector.broadcast %cst_8 : f32 to vector<8x512xf32>
    %33 = vector.broadcast %cst_9 : f32 to vector<8x512xf32>
    %34 = arith.select %25, %32, %33 : vector<8x512xi1>, vector<8x512xf32>
    %cst_10 = arith.constant 3.43273939E-7 : f32
    %cst_11 = arith.constant 1.00950558E-4 : f32
    %35 = vector.broadcast %cst_10 : f32 to vector<8x512xf32>
    %36 = vector.broadcast %cst_11 : f32 to vector<8x512xf32>
    %37 = arith.select %25, %35, %36 : vector<8x512xi1>, vector<8x512xf32>
    %38 = arith.mulf %34, %31 : vector<8x512xf32>
    %39 = arith.addf %37, %38 : vector<8x512xf32>
    %cst_12 = arith.constant -3.5233877E-6 : f32
    %cst_13 = arith.constant 0.00134934322 : f32
    %40 = vector.broadcast %cst_12 : f32 to vector<8x512xf32>
    %41 = vector.broadcast %cst_13 : f32 to vector<8x512xf32>
    %42 = arith.select %25, %40, %41 : vector<8x512xi1>, vector<8x512xf32>
    %43 = arith.mulf %39, %31 : vector<8x512xf32>
    %44 = arith.addf %42, %43 : vector<8x512xf32>
    %cst_14 = arith.constant -4.39150654E-6 : f32
    %cst_15 = arith.constant -0.00367342844 : f32
    %45 = vector.broadcast %cst_14 : f32 to vector<8x512xf32>
    %46 = vector.broadcast %cst_15 : f32 to vector<8x512xf32>
    %47 = arith.select %25, %45, %46 : vector<8x512xi1>, vector<8x512xf32>
    %48 = arith.mulf %44, %31 : vector<8x512xf32>
    %49 = arith.addf %47, %48 : vector<8x512xf32>
    %cst_16 = arith.constant 2.1858087E-4 : f32
    %cst_17 = arith.constant 0.00573950773 : f32
    %50 = vector.broadcast %cst_16 : f32 to vector<8x512xf32>
    %51 = vector.broadcast %cst_17 : f32 to vector<8x512xf32>
    %52 = arith.select %25, %50, %51 : vector<8x512xi1>, vector<8x512xf32>
    %53 = arith.mulf %49, %31 : vector<8x512xf32>
    %54 = arith.addf %52, %53 : vector<8x512xf32>
    %cst_18 = arith.constant -0.00125372503 : f32
    %cst_19 = arith.constant -0.0076224613 : f32
    %55 = vector.broadcast %cst_18 : f32 to vector<8x512xf32>
    %56 = vector.broadcast %cst_19 : f32 to vector<8x512xf32>
    %57 = arith.select %25, %55, %56 : vector<8x512xi1>, vector<8x512xf32>
    %58 = arith.mulf %54, %31 : vector<8x512xf32>
    %59 = arith.addf %57, %58 : vector<8x512xf32>
    %cst_20 = arith.constant -0.00417768164 : f32
    %cst_21 = arith.constant 0.00943887047 : f32
    %60 = vector.broadcast %cst_20 : f32 to vector<8x512xf32>
    %61 = vector.broadcast %cst_21 : f32 to vector<8x512xf32>
    %62 = arith.select %25, %60, %61 : vector<8x512xi1>, vector<8x512xf32>
    %63 = arith.mulf %59, %31 : vector<8x512xf32>
    %64 = arith.addf %62, %63 : vector<8x512xf32>
    %cst_22 = arith.constant 0.246640727 : f32
    %cst_23 = arith.constant 1.00167406 : f32
    %65 = vector.broadcast %cst_22 : f32 to vector<8x512xf32>
    %66 = vector.broadcast %cst_23 : f32 to vector<8x512xf32>
    %67 = arith.select %25, %65, %66 : vector<8x512xi1>, vector<8x512xf32>
    %68 = arith.mulf %64, %31 : vector<8x512xf32>
    %69 = arith.addf %67, %68 : vector<8x512xf32>
    %cst_24 = arith.constant 1.50140941 : f32
    %cst_25 = arith.constant 2.83297682 : f32
    %70 = vector.broadcast %cst_24 : f32 to vector<8x512xf32>
    %71 = vector.broadcast %cst_25 : f32 to vector<8x512xf32>
    %72 = arith.select %25, %70, %71 : vector<8x512xi1>, vector<8x512xf32>
    %73 = arith.mulf %69, %31 : vector<8x512xf32>
    %74 = arith.addf %72, %73 : vector<8x512xf32>
    %75 = math.absf %17 : vector<8x512xf32>
    %cst_26 = arith.constant 1.000000e+00 : f32
    %76 = vector.broadcast %cst_26 : f32 to vector<8x512xf32>
    %77 = arith.cmpf oeq, %75, %76 : vector<8x512xf32>
    %cst_27 = arith.constant 0x7F800000 : f32
    %78 = vector.broadcast %cst_27 : f32 to vector<8x512xf32>
    %79 = arith.mulf %78, %17 : vector<8x512xf32>
    %80 = arith.mulf %74, %17 : vector<8x512xf32>
    %81 = arith.select %77, %79, %80 : vector<8x512xi1>, vector<8x512xf32>
    %cst_28 = arith.constant 1.41421354 : f32
    %82 = vector.broadcast %cst_28 : f32 to vector<8x512xf32>
    %83 = arith.mulf %82, %81 : vector<8x512xf32>
    %c0_29 = arith.constant 0 : index
    %c0_30 = arith.constant 0 : index
    %84 = vector.load %arg3[%c0_29, %c0_30] : memref<8x512xf32, #tpu.memory_space<vmem>>, vector<8x512xf32>
    %c0_31 = arith.constant 0 : index
    %85 = memref.load %arg2[%c0_31] : memref<1xf32, #tpu.memory_space<smem>>
    %86 = vector.broadcast %85 : f32 to vector<8x512xf32>
    %87 = arith.mulf %86, %83 : vector<8x512xf32>
    %cst_32 = arith.constant 1.000000e+00 : f32
    %88 = vector.broadcast %cst_32 : f32 to vector<8x512xf32>
    %89 = arith.addf %88, %87 : vector<8x512xf32>
    %90 = arith.mulf %84, %89 : vector<8x512xf32>
    %c0_33 = arith.constant 0 : index
    %c0_34 = arith.constant 0 : index
    %91 = vector.load %arg4[%c0_33, %c0_34] : memref<8x512xf32, #tpu.memory_space<vmem>>, vector<8x512xf32>
    tpu.vector_store %arg4[%c0_33, %c0_34], %90 {strides = array<i32>} : memref<8x512xf32, #tpu.memory_space<vmem>>, vector<8x512xf32>,
    return
  }
  func.func @transform_0(%arg0: i32) -> i32 {
    %c0_i32 = arith.constant 0 : i32
    %c0_i32_0 = arith.constant 0 : i32
    return %c0_i32 : i32
  }
  func.func @transform_1(%arg0: i32) -> i32 {
    %c0_i32 = arith.constant 0 : i32
    %c0_i32_0 = arith.constant 0 : i32
    return %c0_i32 : i32
  }
  func.func @transform_2(%arg0: i32) -> (i32, i32) {
    %c0_i32 = arith.constant 0 : i32
    %c0_i32_0 = arith.constant 0 : i32
    return %arg0, %c0_i32 : i32, i32
  }
  func.func @transform_3(%arg0: i32) -> (i32, i32) {
    %c0_i32 = arith.constant 0 : i32
    %c0_i32_0 = arith.constant 0 : i32
    return %arg0, %c0_i32 : i32, i32
  }
}

module attributes {stable_mosaic.version = 11 : i64} {
  func.func @kernel(%arg0: i32, %arg1: memref<1xi32, #tpu.memory_space<smem>>, %arg2: memref<1xf32, #tpu.memory_space<smem>>, %arg3: memref<8x512xf32, #tpu.memory_space<vmem>>, %arg4: memref<8x512xf32, #tpu.memory_space<vmem>>) attributes {dimension_semantics = [#tpu.dimension_semantics<parallel>], iteration_bounds = array<i64: 1>, scalar_prefetch = 0 : i64, scratch_operands = 0 : i64, tpu.core_type = #tpu.core_type<tc>, window_params = [{transform_indices = @transform_0, window_bounds = array<i64: 1>}, {transform_indices = @transform_1, window_bounds = array<i64: 1>}, {transform_indices = @transform_2, window_bounds = array<i64: 8, 512>}, {transform_indices = @transform_3, window_bounds = array<i64: 8, 512>}]} {
    %c0 = arith.constant 0 : index
    %0 = memref.load %arg1[%c0] : memref<1xi32, #tpu.memory_space<smem>>
    "tpu.prng_set_seed_32"(%0, %arg0) : (i32, i32) -> ()
    %1 = "tpu.prng_random_bits"() : () -> vector<8x512xi32>
    %c8388607_i32 = arith.constant 8388607 : i32
    %2 = vector.broadcast %c8388607_i32 : i32 to vector<8x512xi32>
    %3 = arith.andi %1, %2 : vector<8x512xi32>
    %c1065353216_i32 = arith.constant 1065353216 : i32
    %4 = vector.broadcast %c1065353216_i32 : i32 to vector<8x512xi32>
    %5 = arith.ori %3, %4 : vector<8x512xi32>
    %6 = tpu.bitcast %5 : vector<8x512xi32> -> vector<8x512xf32>
    %cst = arith.constant 1.000000e+00 : f32
    %7 = vector.broadcast %cst : f32 to vector<8x512xf32>
    %8 = arith.subf %6, %7 : vector<8x512xf32>
    %cst_0 = arith.constant 1.000000e+00 : f32
    %9 = vector.broadcast %cst_0 : f32 to vector<8x512xf32>
    %10 = arith.subf %9, %8 : vector<8x512xf32>
    %11 = "tpu.prng_random_bits"() : () -> vector<8x512xi32>
    %c8388607_i32_1 = arith.constant 8388607 : i32
    %12 = vector.broadcast %c8388607_i32_1 : i32 to vector<8x512xi32>
    %13 = arith.andi %11, %12 : vector<8x512xi32>
    %c1065353216_i32_2 = arith.constant 1065353216 : i32
    %14 = vector.broadcast %c1065353216_i32_2 : i32 to vector<8x512xi32>
    %15 = arith.ori %13, %14 : vector<8x512xi32>
    %16 = tpu.bitcast %15 : vector<8x512xi32> -> vector<8x512xf32>
    %cst_3 = arith.constant 1.000000e+00 : f32
    %17 = vector.broadcast %cst_3 : f32 to vector<8x512xf32>
    %18 = arith.subf %16, %17 : vector<8x512xf32>
    %19 = math.log %10 : vector<8x512xf32>
    %cst_4 = arith.constant -2.000000e+00 : f32
    %20 = vector.broadcast %cst_4 : f32 to vector<8x512xf32>
    %21 = arith.mulf %20, %19 : vector<8x512xf32>
    %22 = math.sqrt %21 : vector<8x512xf32>
    %cst_5 = arith.constant 6.28318548 : f32
    %23 = vector.broadcast %cst_5 : f32 to vector<8x512xf32>
    %24 = arith.mulf %23, %18 : vector<8x512xf32>
    %25 = math.cos %24 : vector<8x512xf32>
    %26 = arith.mulf %22, %25 : vector<8x512xf32>
    %c0_6 = arith.constant 0 : index
    %c0_7 = arith.constant 0 : index
    %27 = vector.load %arg3[%c0_6, %c0_7] : memref<8x512xf32, #tpu.memory_space<vmem>>, vector<8x512xf32>
    %c0_8 = arith.constant 0 : index
    %28 = memref.load %arg2[%c0_8] : memref<1xf32, #tpu.memory_space<smem>>
    %29 = vector.broadcast %28 : f32 to vector<8x512xf32>
    %30 = arith.mulf %29, %26 : vector<8x512xf32>
    %cst_9 = arith.constant 1.000000e+00 : f32
    %31 = vector.broadcast %cst_9 : f32 to vector<8x512xf32>
    %32 = arith.addf %31, %30 : vector<8x512xf32>
    %33 = arith.mulf %27, %32 : vector<8x512xf32>
    %c0_10 = arith.constant 0 : index
    %c0_11 = arith.constant 0 : index
    %34 = vector.load %arg4[%c0_10, %c0_11] : memref<8x512xf32, #tpu.memory_space<vmem>>, vector<8x512xf32>
    tpu.vector_store %arg4[%c0_10, %c0_11], %33 {strides = array<i32>} : memref<8x512xf32, #tpu.memory_space<vmem>>, vector<8x512xf32>,
    return
  }
  func.func @transform_0(%arg0: i32) -> i32 {
    %c0_i32 = arith.constant 0 : i32
    %c0_i32_0 = arith.constant 0 : i32
    return %c0_i32 : i32
  }
  func.func @transform_1(%arg0: i32) -> i32 {
    %c0_i32 = arith.constant 0 : i32
    %c0_i32_0 = arith.constant 0 : i32
    return %c0_i32 : i32
  }
  func.func @transform_2(%arg0: i32) -> (i32, i32) {
    %c0_i32 = arith.constant 0 : i32
    %c0_i32_0 = arith.constant 0 : i32
    return %arg0, %c0_i32 : i32, i32
  }
  func.func @transform_3(%arg0: i32) -> (i32, i32) {
    %c0_i32 = arith.constant 0 : i32
    %c0_i32_0 = arith.constant 0 : i32
    return %arg0, %c0_i32 : i32, i32
  }
}

module attributes {stable_mosaic.version = 11 : i64} {
  func.func @_streamed_kernel(%arg0: i32, %arg1: memref<1xf32, #tpu.memory_space<smem>>, %arg2: memref<32x512xf32, #tpu.memory_space<vmem>>, %arg3: memref<32x512xf32, #tpu.memory_space<vmem>>, %arg4: memref<32x512xf32, #tpu.memory_space<vmem>>) attributes {dimension_semantics = [#tpu.dimension_semantics<parallel>], iteration_bounds = array<i64: 1>, scalar_prefetch = 0 : i64, scratch_operands = 0 : i64, tpu.core_type = #tpu.core_type<tc>, window_params = [{transform_indices = @transform_0, window_bounds = array<i64: 1>}, {transform_indices = @transform_1, window_bounds = array<i64: 32, 512>}, {transform_indices = @transform_2, window_bounds = array<i64: 32, 512>}, {transform_indices = @transform_3, window_bounds = array<i64: 32, 512>}]} {
    %c0 = arith.constant 0 : index
    %c0_0 = arith.constant 0 : index
    %0 = vector.load %arg2[%c0, %c0_0] : memref<32x512xf32, #tpu.memory_space<vmem>>, vector<32x512xf32>
    %c0_1 = arith.constant 0 : index
    %1 = memref.load %arg1[%c0_1] : memref<1xf32, #tpu.memory_space<smem>>
    %c0_2 = arith.constant 0 : index
    %c0_3 = arith.constant 0 : index
    %2 = vector.load %arg3[%c0_2, %c0_3] : memref<32x512xf32, #tpu.memory_space<vmem>>, vector<32x512xf32>
    %3 = vector.broadcast %1 : f32 to vector<32x512xf32>
    %4 = arith.mulf %3, %2 : vector<32x512xf32>
    %cst = arith.constant 1.000000e+00 : f32
    %5 = vector.broadcast %cst : f32 to vector<32x512xf32>
    %6 = arith.addf %5, %4 : vector<32x512xf32>
    %7 = arith.mulf %0, %6 : vector<32x512xf32>
    %c0_4 = arith.constant 0 : index
    %c0_5 = arith.constant 0 : index
    %8 = vector.load %arg4[%c0_4, %c0_5] : memref<32x512xf32, #tpu.memory_space<vmem>>, vector<32x512xf32>
    tpu.vector_store %arg4[%c0_4, %c0_5], %7 {strides = array<i32>} : memref<32x512xf32, #tpu.memory_space<vmem>>, vector<32x512xf32>,
    return
  }
  func.func @transform_0(%arg0: i32) -> i32 {
    %c0_i32 = arith.constant 0 : i32
    %c0_i32_0 = arith.constant 0 : i32
    return %c0_i32 : i32
  }
  func.func @transform_1(%arg0: i32) -> (i32, i32) {
    %c0_i32 = arith.constant 0 : i32
    %c0_i32_0 = arith.constant 0 : i32
    return %arg0, %c0_i32 : i32, i32
  }
  func.func @transform_2(%arg0: i32) -> (i32, i32) {
    %c0_i32 = arith.constant 0 : i32
    %c0_i32_0 = arith.constant 0 : i32
    return %arg0, %c0_i32 : i32, i32
  }
  func.func @transform_3(%arg0: i32) -> (i32, i32) {
    %c0_i32 = arith.constant 0 : i32
    %c0_i32_0 = arith.constant 0 : i32
    return %arg0, %c0_i32 : i32, i32
  }
}

</mosaic_0001>

<bundles_post_ra>
// kernel: tpu_custom_call.1
= control target key start
LH: loop header
LB: loop body
LE: loop exit
PB: predicated region body
PF: predicated region fallthrough
CT: control target
= control target key end

     0   :  { %10 = vsyncpa [#allocation5], 0  ;;  %s778_s0 = inlined_call_operand.<no memory space> [shape: s32[1], index: 0, kind: input, shape index: {}]   ;;  %s779_s1 = inlined_call_operand.<no memory space> [shape: f32[1], index: 1, kind: input, shape index: {}]   ;;  %s780_s2 = inlined_call_operand.hbm [shape: f32[8,512], index: 2, kind: input, shape index: {}]   ;;  %s781_s3 = inlined_call_operand.hbm [shape: f32[8,512], index: 3, kind: output, shape index: {}]  }
   0x1   :  { %11 = vsyncpa [#allocation6], 0  ;;  %s522_s12 = smov [#allocation4]  }
   0x2   :  { %s22_s13 = sshll.u32 %s522_s12, 4  ;;  %s23_s13 = int_to_ptr.vmem [resolvable:$true] %s22_s13 }
   0x3   :  { %s486_s14 = scalar_lea.vmem %s23_s13, 512  ;;  %p491_p1 = scmp.lt.s32.totalorder %s23_s13, %s23_s13 }
   0x4   :  { %p487_p0 = scmp.ne.s32.totalorder %s23_s13, %s486_s14  ;;  %p492_p2 = scmp.lt.s32.totalorder %s486_s14, %s486_s14 }
   0x6   :  { %p493_p3 = por %p492_p2, %p491_p1 }
   0x8   :  { %p494_p4 = pnand %p493_p3, %p487_p0 }
   0xa   :  { %497 = shalt.err (!%p494_p4)
}
   0xb   :  { %25 = dma.hbm_to_vmem [thread:$0]  %s780_s2, 512, %s23_s13, [#allocation5]   ;;  %v30_v0 = vlaneseq  ;;  %v559_v1 = vstv %s778_s0 }
   0xc   :  { %518 = dma.done.wait [#allocation5], 512  }
   0xd   :  { %519 = vsyncadd [#allocation5], 4294966784  ;;  %v36_v2 = vadd.s32 %v559_v1, %v30_v0  ;;  %v563_v21 = vxor.u32 466688986, %v559_v1 }
   0xf   :  { %v37_v3 = vadd.s32 %v36_v2, %v30_v0  ;;  %v38_v4 = vshll.u32 %v36_v2, 13  ;;  %v39_v5 = vshrl.u32 %v36_v2, 19 }
  0x11   :  { %v40_v6 = vor.u32 %v39_v5, %v38_v4 }
  0x13   :  { %v41_v7 = vxor.u32 %v40_v6, %v37_v3 }
  0x15   :  { %v42_v8 = vadd.s32 %v41_v7, %v37_v3  ;;  %v43_v9 = vshll.u32 %v41_v7, 15  ;;  %v44_v10 = vshrl.u32 %v41_v7, 17 }
  0x17   :  { %v45_v11 = vor.u32 %v44_v10, %v43_v9 }
  0x19   :  { %v46_v12 = vxor.u32 %v45_v11, %v42_v8 }
  0x1b   :  { %v47_v13 = vadd.s32 %v46_v12, %v42_v8  ;;  %v48_v14 = vshll.u32 %v46_v12, 26  ;;  %v49_v15 = vshrl.u32 %v46_v12, 6 }
  0x1d   :  { %v50_v16 = vor.u32 %v49_v15, %v48_v14 }
  0x1f   :  { %v51_v17 = vxor.u32 %v50_v16, %v47_v13 }
  0x21   :  { %v52_v18 = vadd.s32 %v51_v17, %v47_v13  ;;  %v53_v19 = vshll.u32 %v51_v17, 6  ;;  %v54_v20 = vshrl.u32 %v51_v17, 26 }
  0x23   :  { %v55_v22 = vor.u32 %v54_v20, %v53_v19  ;;  %v57_v24 = vadd.s32 %v52_v18, %v559_v1 }
  0x25   :  { %v56_v23 = vxor.u32 %v55_v22, %v52_v18 }
  0x27   :  { %v58_v25 = vadd.s32 %v56_v23, %v563_v21 }
  0x29   :  { %v59_v26 = vadd.s32 1, %v58_v25 }
  0x2b   :  { %v60_v27 = vadd.s32 %v59_v26, %v57_v24  ;;  %v61_v28 = vshll.u32 %v59_v26, 17  ;;  %v62_v29 = vshrl.u32 %v59_v26, 15 }
  0x2d   :  { %v63_v30 = vor.u32 %v62_v29, %v61_v28 }
  0x2f   :  { %v64_v31 = vxor.u32 %v63_v30, %v60_v27 }
  0x31   :  { %v65_v32 = vadd.s32 %v64_v31, %v60_v27  ;;  %v66_v33 = vshll.u32 %v64_v31, 29  ;;  %v67_v34 = vshrl.u32 %v64_v31, 3 }
  0x33   :  { %v68_v35 = vor.u32 %v67_v34, %v66_v33 }
  0x35   :  { %v69_v36 = vxor.u32 %v68_v35, %v65_v32 }
  0x37   :  { %v70_v37 = vadd.s32 %v69_v36, %v65_v32  ;;  %v71_v38 = vshll.u32 %v69_v36, 16  ;;  %v72_v39 = vshrl.u32 %v69_v36, 16 }
  0x39   :  { %v73_v40 = vor.u32 %v72_v39, %v71_v38 }
  0x3b   :  { %v74_v41 = vxor.u32 %v73_v40, %v70_v37 }
  0x3d   :  { %v75_v42 = vadd.s32 %v74_v41, %v70_v37  ;;  %v76_v43 = vshll.u32 %v74_v41, 24  ;;  %v77_v44 = vshrl.u32 %v74_v41, 8 }
  0x3f   :  { %v78_v45 = vor.u32 %v77_v44, %v76_v43  ;;  %v80_v47 = vadd.s32 %v75_v42, %v563_v21 }
  0x41   :  { %v79_v46 = vxor.u32 %v78_v45, %v75_v42 }
  0x43   :  { %v82_v48 = vadd.s32 2, %v79_v46 }
  0x45   :  { %v83_v49 = vadd.s32 %v82_v48, %v80_v47  ;;  %v84_v50 = vshll.u32 %v82_v48, 13  ;;  %v85_v51 = vshrl.u32 %v82_v48, 19 }
  0x47   :  { %v86_v52 = vor.u32 %v85_v51, %v84_v50 }
  0x49   :  { %v87_v53 = vxor.u32 %v86_v52, %v83_v49 }
  0x4b   :  { %v88_v54 = vadd.s32 %v87_v53, %v83_v49  ;;  %v89_v55 = vshll.u32 %v87_v53, 15  ;;  %v90_v56 = vshrl.u32 %v87_v53, 17 }
  0x4d   :  { %v91_v57 = vor.u32 %v90_v56, %v89_v55 }
  0x4f   :  { %v92_v58 = vxor.u32 %v91_v57, %v88_v54 }
  0x51   :  { %v93_v59 = vadd.s32 %v92_v58, %v88_v54  ;;  %v94_v60 = vshll.u32 %v92_v58, 26  ;;  %v95_v61 = vshrl.u32 %v92_v58, 6 }
  0x53   :  { %v96_v62 = vor.u32 %v95_v61, %v94_v60 }
  0x55   :  { %v97_v63 = vxor.u32 %v96_v62, %v93_v59 }
  0x57   :  { %v98_v0 = vadd.s32 %v97_v63, %v93_v59  ;;  %v99_v2 = vshll.u32 %v97_v63, 6  ;;  %v100_v3 = vshrl.u32 %v97_v63, 26 }
  0x59   :  { %v101_v4 = vor.u32 %v100_v3, %v99_v2 }
  0x5b   :  { %v102_v5 = vxor.u32 %v101_v4, %v98_v0 }
  0x5d   :  { %v104_v6 = vadd.s32 %v102_v5, %v559_v1 }
  0x5f   :  { %v105_v7 = vadd.s32 3, %v104_v6 }
  0x61   :  { %v106_v8 = vadd.s32 %v105_v7, %v98_v0  ;;  %v107_v9 = vshll.u32 %v105_v7, 17  ;;  %v108_v10 = vshrl.u32 %v105_v7, 15 }
  0x63   :  { %v109_v11 = vor.u32 %v108_v10, %v107_v9 }
  0x65   :  { %v110_v12 = vxor.u32 %v109_v11, %v106_v8 }
  0x67   :  { %v111_v13 = vadd.s32 %v110_v12, %v106_v8  ;;  %v112_v14 = vshll.u32 %v110_v12, 29  ;;  %v113_v15 = vshrl.u32 %v110_v12, 3 }
  0x69   :  { %v114_v16 = vor.u32 %v113_v15, %v112_v14 }
  0x6b   :  { %v115_v17 = vxor.u32 %v114_v16, %v111_v13 }
  0x6d   :  { %v116_v18 = vadd.s32 %v115_v17, %v111_v13  ;;  %v117_v19 = vshll.u32 %v115_v17, 16  ;;  %v118_v20 = vshrl.u32 %v115_v17, 16 }
  0x6f   :  { %v119_v22 = vor.u32 %v118_v20, %v117_v19 }
  0x71   :  { %v120_v23 = vxor.u32 %v119_v22, %v116_v18 }
  0x73   :  { %v121_v24 = vadd.s32 %v120_v23, %v116_v18  ;;  %v122_v25 = vshll.u32 %v120_v23, 24  ;;  %v123_v26 = vshrl.u32 %v120_v23, 8 }
  0x75   :  { %v124_v27 = vor.u32 %v123_v26, %v122_v25  ;;  %v126_v29 = vadd.s32 %v121_v24, %v559_v1 }
  0x77   :  { %v125_v28 = vxor.u32 %v124_v27, %v121_v24 }
  0x79   :  { %v127_v30 = vadd.s32 %v125_v28, %v563_v21 }
  0x7b   :  { %v128_v31 = vadd.s32 4, %v127_v30 }
  0x7d   :  { %v129_v32 = vadd.s32 %v128_v31, %v126_v29  ;;  %v130_v33 = vshll.u32 %v128_v31, 13  ;;  %v131_v34 = vshrl.u32 %v128_v31, 19 }
  0x7f   :  { %v132_v35 = vor.u32 %v131_v34, %v130_v33 }
  0x81   :  { %v133_v36 = vxor.u32 %v132_v35, %v129_v32 }
  0x83   :  { %v134_v37 = vadd.s32 %v133_v36, %v129_v32  ;;  %v135_v38 = vshll.u32 %v133_v36, 15  ;;  %v136_v39 = vshrl.u32 %v133_v36, 17 }
  0x85   :  { %v137_v40 = vor.u32 %v136_v39, %v135_v38 }
  0x87   :  { %v138_v41 = vxor.u32 %v137_v40, %v134_v37 }
  0x89   :  { %v139_v42 = vadd.s32 %v138_v41, %v134_v37  ;;  %v140_v43 = vshll.u32 %v138_v41, 26  ;;  %v141_v44 = vshrl.u32 %v138_v41, 6 }
  0x8b   :  { %v142_v45 = vor.u32 %v141_v44, %v140_v43 }
  0x8d   :  { %v143_v46 = vxor.u32 %v142_v45, %v139_v42 }
  0x8f   :  { %v144_v47 = vadd.s32 %v143_v46, %v139_v42  ;;  %v145_v1 = vshll.u32 %v143_v46, 6  ;;  %v146_v48 = vshrl.u32 %v143_v46, 26 }
  0x91   :  { %v147_v49 = vor.u32 %v146_v48, %v145_v1  ;;  %v149_v51 = vadd.s32 %v144_v47, %v563_v21 }
  0x93   :  { %v148_v50 = vxor.u32 %v147_v49, %v144_v47 }
  0x95   :  { %v151_v52 = vadd.s32 5, %v148_v50 }
  0x97   :  { %v152_v53 = vxor.u32 %v151_v52, %v149_v51 }
  0x99   :  { %153 = set.rngseed %v152_v53 }
  0x9a   :  { %v154_v54 = vrng }
  0x9b   :  { %v158_v55 = vshrl.u32 %v154_v54, 9  ;;  %v155_v56 = vrng }
  0x9c   :  { %v159_v57 = vshrl.u32 %v155_v56, 9  ;;  %v156_v58 = vrng }
  0x9d   :  { %v162_v59 = vor.u32 1065353216, %v158_v55  ;;  %v160_v60 = vshrl.u32 %v156_v58, 9  ;;  %v157_v61 = vrng }
  0x9e   :  { %v163_v62 = vor.u32 1065353216, %v159_v57  ;;  %v161_v63 = vshrl.u32 %v157_v61, 9 }
  0x9f   :  { %v439_v0 = vadd.f32 -1.0, %v162_v59  ;;  %v164_v2 = vor.u32 1065353216, %v160_v60 }
  0xa0   :  { %v440_v3 = vadd.f32 -1.0, %v163_v62  ;;  %v165_v4 = vor.u32 1065353216, %v161_v63 }
  0xa1   :  { %v174_v5 = vmul.f32 2.0, %v439_v0  ;;  %v441_v6 = vadd.f32 -1.0, %v164_v2 }
  0xa2   :  { %v175_v21 = vmul.f32 2.0, %v440_v3  ;;  %v442_v7 = vadd.f32 -1.0, %v165_v4 }
  0xa3   :  { %v178_v8 = vadd.f32 -0.99999994, %v174_v5  ;;  %v176_v9 = vmul.f32 2.0, %v441_v6 }
  0xa4   :  { %v179_v10 = vadd.f32 -0.99999994, %v175_v21  ;;  %v177_v11 = vmul.f32 2.0, %v442_v7 }
  0xa5   :  { %v572_v12 = vmax.f32 %v178_v8, -0.99999994  ;;  %v180_v13 = vadd.f32 -0.99999994, %v176_v9 }
  0xa6   :  { %v574_v14 = vmax.f32 %v179_v10, -0.99999994  ;;  %v181_v15 = vadd.f32 -0.99999994, %v177_v11  ;;  %v523_v11 = vmov -0.00020021426  }
  0xa7   :  { %v186_v16 = vsub.f32 0.0, %v572_v12  ;;  %v577_v17 = vmax.f32 %v180_v13, -0.99999994 }
  0xa8   :  { %v187_v18 = vsub.f32 0.0, %v574_v14  ;;  %v580_v19 = vmax.f32 %v181_v15, -0.99999994 }
  0xa9   :  { %v190_v20 = vmul.f32 %v186_v16, %v572_v12  ;;  %v188_v22 = vsub.f32 0.0, %v577_v17 }
  0xaa   :  { %v191_v23 = vmul.f32 %v187_v18, %v574_v14  ;;  %v189_v27 = vsub.f32 0.0, %v580_v19 }
  0xab   :  { %v194_v24 = vadd.f32 1.0, %v190_v20  ;;  %v192_v25 = vmul.f32 %v188_v22, %v577_v17  ;;  %v197_v30 = vmul.f32 -0.5, %v190_v20  ;;  %v200_v34 = vand.u32 2147483647, %v190_v20 }
  0xac   :  { %v203_v26 = vadd.f32 1.0, %v191_v23  ;;  %v193_v29 = vmul.f32 %v189_v27, %v580_v19  ;;  %v206_v31 = vmul.f32 -0.5, %v191_v23  ;;  %v209_v36 = vand.u32 2147483647, %v191_v23 }
  0xad   :  { %462 = vlog2.f32 %v194_v24  ;;  %v212_v28 = vadd.f32 1.0, %v192_v25  ;;  %v198_v33 = vadd.f32 1.0, %v197_v30  ;;  %v215_v41 = vmul.f32 -0.5, %v192_v25 }
  0xae   :  { %464 = vlog2.f32 %v203_v26  ;;  %v221_v32 = vadd.f32 1.0, %v193_v29  ;;  %v207_v35 = vadd.f32 1.0, %v206_v31  ;;  %vm201_vm0 = vcmp.lt.f32.partialorder %v200_v34, 0.0004427343 }
  0xaf   :  { %466 = vlog2.f32 %v212_v28  ;;  %v199_v40 = vmul.f32 %v198_v33, %v190_v20  ;;  %vm210_vm1 = vcmp.lt.f32.partialorder %v209_v36, 0.0004427343  ;;  %v216_v48 = vadd.f32 1.0, %v215_v41 }
  0xb0   :  { %468 = vlog2.f32 %v221_v32  ;;  %v208_v43 = vmul.f32 %v207_v35, %v191_v23  ;;  %v218_v49 = vand.u32 2147483647, %v192_v25  ;;  %v224_v51 = vmul.f32 -0.5, %v193_v29 }
  0xb1   :  { %v217_v52 = vmul.f32 %v216_v48, %v192_v25  ;;  %v227_v56 = vand.u32 2147483647, %v193_v29  ;;  %v524_v20 = vmov 0.00010095056   ;;  %v525_v33 = vmov 0.0013493432  }
  0xb2   :  { %vm219_vm2 = vcmp.lt.f32.partialorder %v218_v49, 0.0004427343  ;;  %v225_v55 = vadd.f32 1.0, %v224_v51 }
  0xb3   :  { %vm228_vm3 = vcmp.lt.f32.partialorder %v227_v56, 0.0004427343 }
  0xb4   :  { %v226_v59 = vmul.f32 %v225_v55, %v193_v29 }
  0xba   :  { %v463_v37 = vpop.eup %462 }
  0xbb   :  { %v465_v38 = vpop.eup %464  ;;  %v196_v39 = vmul.f32 0.6931472, %v463_v37 }
  0xbc   :  { %v205_v42 = vmul.f32 0.6931472, %v465_v38  ;;  %v467_v45 = vpop.eup %466 }
  0xbd   :  { %v202_v44 = vsel %vm201_vm0, %v199_v40, %v196_v39  ;;  %v214_v50 = vmul.f32 0.6931472, %v467_v45  ;;  %v469_v53 = vpop.eup %468 }
  0xbe   :  { %v588_v46 = vsub.f32 0.0, %v202_v44  ;;  %v211_v47 = vsel %vm210_vm1, %v208_v43, %v205_v42  ;;  %v223_v58 = vmul.f32 0.6931472, %v469_v53  ;;  %v526_v42 = vmov -0.0036734284  }
  0xbf   :  { %v590_v1 = vsub.f32 0.0, %v211_v47  ;;  %v220_v54 = vsel %vm219_vm2, %v217_v52, %v214_v50 }
  0xc0   :  { %470 = vrsqrt.f32 %v588_v46  ;;  %v594_v57 = vsub.f32 0.0, %v220_v54  ;;  %v229_v60 = vsel %vm228_vm3, %v226_v59, %v223_v58  ;;  %vm244_vm4 = vcmp.eq.f32.partialorder %v588_v46, inf }
  0xc1   :  { %472 = vrsqrt.f32 %v590_v1  ;;  %v598_v63 = vsub.f32 0.0, %v229_v60  ;;  %v247_v2 = vand.u32 2147483648, %v588_v46  ;;  %vm234_vm5 = vcmp.lt.f32.partialorder %v588_v46, 5.0 }
  0xc2   :  { %474 = vrsqrt.f32 %v594_v57  ;;  %vm246_vm6 = vcmp.eq.f32.partialorder %v588_v46, 0.0  ;;  %vm251_vm7 = vcmp.eq.f32.partialorder %v590_v1, inf  ;;  %v254_v6 = vand.u32 2147483648, %v590_v1 }
  0xc3   :  { %476 = vrsqrt.f32 %v598_v63  ;;  %v443_v21 = vadd.f32 -2.5, %v588_v46  ;;  %vm253_vm8 = vcmp.eq.f32.partialorder %v590_v1, 0.0  ;;  %vm235_vm9 = vcmp.lt.f32.partialorder %v590_v1, 5.0 }
  0xc4   :  { %v278_v13 = vsel %vm234_vm5, 2.8102264e-08, %v523_v11  ;;  %v444_v15 = vadd.f32 -2.5, %v590_v1  ;;  %v282_v22 = vsel %vm234_vm5, 3.4327394e-07, %v524_v20  ;;  %vm258_vm10 = vcmp.eq.f32.partialorder %v594_v57, inf }
  0xc5   :  { %v279_v24 = vsel %vm235_vm9, 2.8102264e-08, %v523_v11  ;;  %v283_v28 = vsel %vm235_vm9, 3.4327394e-07, %v524_v20  ;;  %v261_v32 = vand.u32 2147483648, %v594_v57  ;;  %vm260_vm11 = vcmp.eq.f32.partialorder %v594_v57, 0.0 }
  0xc6   :  { %v294_v34 = vsel %vm234_vm5, -3.5233877e-06, %v525_v33  ;;  %vm236_vm12 = vcmp.lt.f32.partialorder %v594_v57, 5.0  ;;  %v295_v39 = vsel %vm235_vm9, -3.5233877e-06, %v525_v33  ;;  %v445_v40 = vadd.f32 -2.5, %v594_v57 }
  0xc7   :  { %v306_v43 = vsel %vm234_vm5, -4.3915065e-06, %v526_v42  ;;  %v307_v48 = vsel %vm235_vm9, -4.3915065e-06, %v526_v42  ;;  %v280_v50 = vsel %vm236_vm12, 2.8102264e-08, %v523_v11 }
  0xc8   :  { %v284_v51 = vsel %vm236_vm12, 3.4327394e-07, %v524_v20  ;;  %vm237_vm13 = vcmp.lt.f32.partialorder %v598_v63, 5.0  ;;  %vm265_vm14 = vcmp.eq.f32.partialorder %v598_v63, inf  ;;  %vm267_vm15 = vcmp.eq.f32.partialorder %v598_v63, 0.0 }
  0xc9   :  { %v268_v56 = vand.u32 2147483648, %v598_v63 }
  0xcd   :  { %v471_v61 = vpop.eup %470 }
  0xce   :  { %v243_v62 = vmul.f32 %v471_v61, %v588_v46  ;;  %v473_v0 = vpop.eup %472 }
  0xcf   :  { %v250_v4 = vmul.f32 %v473_v0, %v590_v1  ;;  %v475_v25 = vpop.eup %474 }
  0xd0   :  { %v245_v3 = vsel %vm244_vm4, %v588_v46, %v243_v62  ;;  %v257_v29 = vmul.f32 %v475_v25, %v594_v57  ;;  %v477_v47 = vpop.eup %476  ;;  %v527_v62 = vmov 0.0057395077  }
  0xd1   :  { %v248_v5 = vsel %vm246_vm6, %v247_v2, %v245_v3  ;;  %v252_v8 = vsel %vm251_vm7, %v590_v1, %v250_v4  ;;  %v264_v55 = vmul.f32 %v477_v47, %v598_v63  ;;  %v318_v0 = vsel %vm234_vm5, 0.00021858087, %v527_v62 }
  0xd2   :  { %v447_v7 = vadd.f32 -3.0, %v248_v5  ;;  %v255_v9 = vsel %vm253_vm8, %v254_v6, %v252_v8  ;;  %v259_v35 = vsel %vm258_vm10, %v594_v57, %v257_v29  ;;  %v446_v2 = vadd.f32 -2.5, %v598_v63 }
  0xd3   :  { %v448_v16 = vadd.f32 -3.0, %v255_v9  ;;  %v262_v38 = vsel %vm260_vm11, %v261_v32, %v259_v35  ;;  %v266_v61 = vsel %vm265_vm14, %v598_v63, %v264_v55  ;;  %v296_v8 = vsel %vm236_vm12, -3.5233877e-06, %v525_v33 }
  0xd4   :  { %v615_v10 = vsel %vm234_vm5, %v443_v21, %v447_v7  ;;  %v449_v41 = vadd.f32 -3.0, %v262_v38  ;;  %v269_v3 = vsel %vm267_vm15, %v268_v56, %v266_v61  ;;  %v319_v7 = vsel %vm235_vm9, 0.00021858087, %v527_v62 }
  0xd5   :  { %v286_v18 = vmul.f32 %v278_v13, %v615_v10  ;;  %v626_v23 = vsel %vm235_vm9, %v444_v15, %v448_v16  ;;  %v450_v21 = vadd.f32 -3.0, %v269_v3  ;;  %v281_v9 = vsel %vm237_vm13, 2.8102264e-08, %v523_v11 }
  0xd6   :  { %v287_v27 = vmul.f32 %v279_v24, %v626_v23  ;;  %v658_v49 = vsel %vm236_vm12, %v445_v40, %v449_v41  ;;  %v285_v11 = vsel %vm237_vm13, 3.4327394e-07, %v524_v20  ;;  %v297_v41 = vsel %vm237_vm13, -3.5233877e-06, %v525_v33 }
  0xd7   :  { %v290_v26 = vadd.f32 %v286_v18, %v282_v22  ;;  %v288_v54 = vmul.f32 %v280_v50, %v658_v49  ;;  %v689_v18 = vsel %vm237_vm13, %v446_v2, %v450_v21  ;;  %v528_v22 = vmov -0.0076224613  }
  0xd8   :  { %v291_v31 = vadd.f32 %v287_v27, %v283_v28  ;;  %v330_v24 = vsel %vm234_vm5, -0.001253725, %v528_v22  ;;  %v289_v25 = vmul.f32 %v281_v9, %v689_v18  ;;  %v331_v29 = vsel %vm235_vm9, -0.001253725, %v528_v22 }
  0xd9   :  { %v298_v30 = vmul.f32 %v290_v26, %v615_v10  ;;  %v292_v60 = vadd.f32 %v288_v54, %v284_v51  ;;  %v530_v51 = vmov 1.001674   ;;  %v309_v56 = vsel %vm237_vm13, -4.3915065e-06, %v526_v42 }
  0xda   :  { %v299_v37 = vmul.f32 %v291_v31, %v626_v23  ;;  %v293_v31 = vadd.f32 %v289_v25, %v285_v11  ;;  %v531_v3 = vmov 2.8329768   ;;  %v379_v9 = vand.u32 2147483647, %v574_v14 }
  0xdb   :  { %v302_v36 = vadd.f32 %v298_v30, %v294_v34  ;;  %v300_v6 = vmul.f32 %v292_v60, %v658_v49  ;;  %v308_v30 = vsel %vm236_vm12, -4.3915065e-06, %v526_v42  ;;  %v387_v25 = vmul.f32 inf, %v574_v14 }
  0xdc   :  { %v303_v45 = vadd.f32 %v299_v37, %v295_v39  ;;  %v301_v38 = vmul.f32 %v293_v31, %v689_v18  ;;  %v407_v1 = vstv %s779_s1  ;;  %vm383_vm1 = vcmp.eq.f32.partialorder %v379_v9, 1.0  ;;  %s532_s1 = smov [#allocation7]  }
  0xdd   :  { %v310_v44 = vmul.f32 %v302_v36, %v615_v10  ;;  %v304_v16 = vadd.f32 %v300_v6, %v296_v8  ;;  %v529_v36 = vmov 0.0094388705   ;;  %v321_v8 = vsel %vm237_vm13, 0.00021858087, %v527_v62  ;;  %s430_s19 = sshll.u32 %s532_s1, 4  ;;  %s431_s19 = int_to_ptr.vmem [resolvable:$true] %s430_s19 }
  0xde   :  { %v311_v53 = vmul.f32 %v303_v45, %v626_v23  ;;  %v342_v37 = vsel %vm234_vm5, -0.0041776816, %v529_v36  ;;  %v305_v45 = vadd.f32 %v301_v38, %v297_v41  ;;  %v344_v46 = vsel %vm236_vm12, -0.0041776816, %v529_v36  ;;  %s498_s20 = scalar_lea.vmem %s431_s19, 512  ;;  %p503_p6 = scmp.lt.s32.totalorder %s431_s19, %s431_s19 }
  0xdf   :  { %v314_v52 = vadd.f32 %v310_v44, %v306_v43  ;;  %v312_v28 = vmul.f32 %v304_v16, %v658_v49  ;;  %v343_v43 = vsel %vm235_vm9, -0.0041776816, %v529_v36  ;;  %v320_v44 = vsel %vm236_vm12, 0.00021858087, %v527_v62  ;;  %p499_p5 = scmp.ne.s32.totalorder %s431_s19, %s498_s20  ;;  %p504_p7 = scmp.lt.s32.totalorder %s498_s20, %s498_s20 }
  0xe0   :  { %v315_v59 = vadd.f32 %v311_v53, %v307_v48  ;;  %v313_v53 = vmul.f32 %v305_v45, %v689_v18  ;;  %v380_v38 = vand.u32 2147483647, %v577_v17  ;;  %v403_v45 = vld [vmem:[#allocation4 + $0x8] sm:$0xff] }
  0xe1   :  { %v322_v58 = vmul.f32 %v314_v52, %v615_v10  ;;  %v316_v35 = vadd.f32 %v312_v28, %v308_v30  ;;  %v354_v52 = vsel %vm234_vm5, 0.24664073, %v530_v51  ;;  %v333_v28 = vsel %vm237_vm13, -0.001253725, %v528_v22  ;;  %p505_p8 = por %p504_p7, %p503_p6 }
  0xe2   :  { %v323_v5 = vmul.f32 %v315_v59, %v626_v23  ;;  %v332_v59 = vsel %vm236_vm12, -0.001253725, %v528_v22  ;;  %v317_v60 = vadd.f32 %v313_v53, %v309_v56  ;;  %v345_v22 = vsel %vm237_vm13, -0.0041776816, %v529_v36 }
  0xe3   :  { %v326_v4 = vadd.f32 %v322_v58, %v318_v0  ;;  %v324_v40 = vmul.f32 %v316_v35, %v658_v49  ;;  %v355_v58 = vsel %vm235_vm9, 0.24664073, %v530_v51  ;;  %v357_v36 = vsel %vm237_vm13, 0.24664073, %v530_v51  ;;  %p506_p9 = pnand %p505_p8, %p499_p5 }
  0xe4   :  { %v327_v15 = vadd.f32 %v323_v5, %v319_v7  ;;  %v378_v5 = vand.u32 2147483647, %v572_v12  ;;  %v325_v6 = vmul.f32 %v317_v60, %v689_v18  ;;  %vm384_vm2 = vcmp.eq.f32.partialorder %v380_v38, 1.0 }
  0xe5   :  { %v334_v13 = vmul.f32 %v326_v4, %v615_v10  ;;  %v328_v50 = vadd.f32 %v324_v40, %v320_v44  ;;  %v366_v4 = vsel %vm234_vm5, 1.5014094, %v531_v3  ;;  %v369_v56 = vsel %vm237_vm13, 1.5014094, %v531_v3 }
  0xe6   :  { %v335_v27 = vmul.f32 %v327_v15, %v626_v23  ;;  %v386_v15 = vmul.f32 inf, %v572_v12  ;;  %vm382_vm0 = vcmp.eq.f32.partialorder %v378_v5, 1.0 }
  0xe7   :  { %v338_v26 = vadd.f32 %v334_v13, %v330_v24  ;;  %v336_v55 = vmul.f32 %v328_v50, %v658_v49  ;;  %v329_v13 = vadd.f32 %v325_v6, %v321_v8  ;;  %v405_v6 = vld [vmem:[#allocation4 + $0x18] sm:$0xff] }
  0xe8   :  { %v339_v34 = vadd.f32 %v335_v27, %v331_v29 }
  0xe9   :  { %v346_v32 = vmul.f32 %v338_v26, %v615_v10  ;;  %v340_v2 = vadd.f32 %v336_v55, %v332_v59  ;;  %v337_v62 = vmul.f32 %v329_v13, %v689_v18 }
  0xea   :  { %v347_v20 = vmul.f32 %v339_v34, %v626_v23 }
  0xeb   :  { %v350_v39 = vadd.f32 %v346_v32, %v342_v37  ;;  %v348_v7 = vmul.f32 %v340_v2, %v658_v49  ;;  %v341_v29 = vadd.f32 %v337_v62, %v333_v28 }
  0xec   :  { %v351_v48 = vadd.f32 %v347_v20, %v343_v43  ;;  %v368_v20 = vsel %vm236_vm12, 1.5014094, %v531_v3 }
  0xed   :  { %v358_v47 = vmul.f32 %v350_v39, %v615_v10  ;;  %v349_v34 = vmul.f32 %v341_v29, %v689_v18  ;;  %v402_v39 = vld [vmem:[#allocation4] sm:$0xff] }
  0xee   :  { %v359_v33 = vmul.f32 %v351_v48, %v626_v23 }
  0xef   :  { %v362_v54 = vadd.f32 %v358_v47, %v354_v52  ;;  %v353_v40 = vadd.f32 %v349_v34, %v345_v22 }
  0xf0   :  { %v363_v0 = vadd.f32 %v359_v33, %v355_v58  ;;  %v381_v58 = vand.u32 2147483647, %v580_v19 }
  0xf1   :  { %v370_v61 = vmul.f32 %v362_v54, %v615_v10  ;;  %v367_v10 = vsel %vm235_vm9, 1.5014094, %v531_v3  ;;  %v361_v47 = vmul.f32 %v353_v40, %v689_v18 }
  0xf2   :  { %v371_v21 = vmul.f32 %v363_v0, %v626_v23  ;;  %v352_v23 = vadd.f32 %v348_v7, %v344_v46  ;;  %vm385_vm3 = vcmp.eq.f32.partialorder %v381_v58, 1.0 }
  0xf3   :  { %v374_v42 = vadd.f32 %v370_v61, %v366_v4  ;;  %v365_v53 = vadd.f32 %v361_v47, %v357_v36  ;;  %v389_v61 = vmul.f32 inf, %v580_v19 }
  0xf4   :  { %v375_v24 = vadd.f32 %v371_v21, %v367_v10  ;;  %v360_v27 = vmul.f32 %v352_v23, %v658_v49 }
  0xf5   :  { %v390_v16 = vmul.f32 %v374_v42, %v572_v12  ;;  %v356_v12 = vsel %vm236_vm12, 0.24664073, %v530_v51  ;;  %v373_v33 = vmul.f32 %v365_v53, %v689_v18 }
  0xf6   :  { %v391_v26 = vmul.f32 %v375_v24, %v574_v14  ;;  %v364_v31 = vadd.f32 %v360_v27, %v356_v12 }
  0xf7   :  { %v394_v11 = vsel %vm382_vm0, %v386_v15, %v390_v16  ;;  %v377_v59 = vadd.f32 %v373_v33, %v369_v56 }
  0xf8   :  { %v398_v30 = vmul.f32 1.4142135, %v394_v11  ;;  %v395_v32 = vsel %vm383_vm1, %v387_v25, %v391_v26  ;;  %v372_v14 = vmul.f32 %v364_v31, %v658_v49  ;;  %v388_v49 = vmul.f32 inf, %v577_v17 }
  0xf9   :  { %v399_v35 = vmul.f32 1.4142135, %v395_v32  ;;  %v393_v51 = vmul.f32 %v377_v59, %v580_v19 }
  0xfa   :  { %v408_v37 = vmul.f32 %v407_v1, %v398_v30  ;;  %v376_v44 = vadd.f32 %v372_v14, %v368_v20 }
  0xfb   :  { %v409_v41 = vmul.f32 %v407_v1, %v399_v35  ;;  %v397_v2 = vsel %vm385_vm3, %v389_v61, %v393_v51 }
  0xfc   :  { %v412_v43 = vadd.f32 1.0, %v408_v37  ;;  %v392_v52 = vmul.f32 %v376_v44, %v577_v17  ;;  %v404_v17 = vld [vmem:[#allocation4 + $0x10] sm:$0xff]  ;;  %v401_v5 = vmul.f32 1.4142135, %v397_v2 }
  0xfd   :  { %v413_v48 = vadd.f32 1.0, %v409_v41 }
  0xfe   :  { %v416_v50 = vmul.f32 %v412_v43, %v402_v39  ;;  %v396_v54 = vsel %vm384_vm2, %v388_v49, %v392_v52  ;;  %v411_v18 = vmul.f32 %v407_v1, %v401_v5 }
  0xff   :  { %v417_v57 = vmul.f32 %v413_v48, %v403_v45  ;;  %v400_v55 = vmul.f32 1.4142135, %v396_v54 }
 0x100   :  { %420 = vst [vmem:[#allocation7] sm:$0xff] %v416_v50  ;;  %v415_v63 = vadd.f32 1.0, %v411_v18 }
 0x101   :  { %421 = vst [vmem:[#allocation7 + $0x8] sm:$0xff] %v417_v57  ;;  %v410_v60 = vmul.f32 %v407_v1, %v400_v55 }
 0x102   :  { %v419_v3 = vmul.f32 %v415_v63, %v405_v6 }
 0x103   :  { %v414_v0 = vadd.f32 1.0, %v410_v60 }
 0x104   :  { %423 = vst [vmem:[#allocation7 + $0x18] sm:$0xff] %v419_v3 }
 0x105   :  { %v418_v4 = vmul.f32 %v414_v0, %v404_v17 }
 0x107   :  { %422 = vst [vmem:[#allocation7 + $0x10] sm:$0xff] %v418_v4 }
 0x108   :  { %509 = shalt.err (!%p506_p9)
}
 0x109   :  { %433 = dma.vmem_to_hbm [thread:$0]  %s431_s19, 512, %s781_s3, [#allocation6]  }
 0x10a   :  { %520 = dma.done.wait [#allocation6], 512  }
 0x10b   :  { %521 = vsyncadd [#allocation6], 4294966784 }
 0x10c   :  { %437 = vsyncpa [#allocation5], 1 }
 0x10d   :  { %438 = vsyncpa [#allocation6], 1 }

// kernel: tpu_custom_call.1
= control target key start
LH: loop header
LB: loop body
LE: loop exit
PB: predicated region body
PF: predicated region fallthrough
CT: control target
= control target key end

     0   :  { %10 = vsyncpa [#allocation5], 0  ;;  %s1189_s0 = inlined_call_operand.<no memory space> [shape: s32[1], index: 0, kind: input, shape index: {}]   ;;  %s1190_s1 = inlined_call_operand.<no memory space> [shape: f32[1], index: 1, kind: input, shape index: {}]   ;;  %s1191_s2 = inlined_call_operand.hbm [shape: f32[8,512], index: 2, kind: input, shape index: {}]   ;;  %s1192_s3 = inlined_call_operand.hbm [shape: f32[8,512], index: 3, kind: output, shape index: {}]  }
   0x1   :  { %11 = vsyncpa [#allocation6], 0  ;;  %s819_s12 = smov [#allocation4]  }
   0x2   :  { %s22_s13 = sshll.u32 %s819_s12, 4  ;;  %s23_s13 = int_to_ptr.vmem [resolvable:$true] %s22_s13 }
   0x3   :  { %s783_s14 = scalar_lea.vmem %s23_s13, 512  ;;  %p788_p1 = scmp.lt.s32.totalorder %s23_s13, %s23_s13 }
   0x4   :  { %p784_p0 = scmp.ne.s32.totalorder %s23_s13, %s783_s14  ;;  %p789_p2 = scmp.lt.s32.totalorder %s783_s14, %s783_s14 }
   0x6   :  { %p790_p3 = por %p789_p2, %p788_p1 }
   0x8   :  { %p791_p4 = pnand %p790_p3, %p784_p0 }
   0xa   :  { %794 = shalt.err (!%p791_p4)
}
   0xb   :  { %25 = dma.hbm_to_vmem [thread:$0]  %s1191_s2, 512, %s23_s13, [#allocation5]   ;;  %v30_v0 = vlaneseq  ;;  %v853_v1 = vstv %s1189_s0 }
   0xc   :  { %815 = dma.done.wait [#allocation5], 512  }
   0xd   :  { %816 = vsyncadd [#allocation5], 4294966784  ;;  %v36_v2 = vadd.s32 %v853_v1, %v30_v0  ;;  %v857_v21 = vxor.u32 466688986, %v853_v1 }
   0xf   :  { %v37_v3 = vadd.s32 %v36_v2, %v30_v0  ;;  %v38_v4 = vshll.u32 %v36_v2, 13  ;;  %v39_v5 = vshrl.u32 %v36_v2, 19 }
  0x11   :  { %v40_v6 = vor.u32 %v39_v5, %v38_v4 }
  0x13   :  { %v41_v7 = vxor.u32 %v40_v6, %v37_v3 }
  0x15   :  { %v42_v8 = vadd.s32 %v41_v7, %v37_v3  ;;  %v43_v9 = vshll.u32 %v41_v7, 15  ;;  %v44_v10 = vshrl.u32 %v41_v7, 17 }
  0x17   :  { %v45_v11 = vor.u32 %v44_v10, %v43_v9 }
  0x19   :  { %v46_v12 = vxor.u32 %v45_v11, %v42_v8 }
  0x1b   :  { %v47_v13 = vadd.s32 %v46_v12, %v42_v8  ;;  %v48_v14 = vshll.u32 %v46_v12, 26  ;;  %v49_v15 = vshrl.u32 %v46_v12, 6 }
  0x1d   :  { %v50_v16 = vor.u32 %v49_v15, %v48_v14 }
  0x1f   :  { %v51_v17 = vxor.u32 %v50_v16, %v47_v13 }
  0x21   :  { %v52_v18 = vadd.s32 %v51_v17, %v47_v13  ;;  %v53_v19 = vshll.u32 %v51_v17, 6  ;;  %v54_v20 = vshrl.u32 %v51_v17, 26 }
  0x23   :  { %v55_v22 = vor.u32 %v54_v20, %v53_v19  ;;  %v57_v24 = vadd.s32 %v52_v18, %v853_v1 }
  0x25   :  { %v56_v23 = vxor.u32 %v55_v22, %v52_v18 }
  0x27   :  { %v58_v25 = vadd.s32 %v56_v23, %v857_v21 }
  0x29   :  { %v59_v26 = vadd.s32 1, %v58_v25 }
  0x2b   :  { %v60_v27 = vadd.s32 %v59_v26, %v57_v24  ;;  %v61_v28 = vshll.u32 %v59_v26, 17  ;;  %v62_v29 = vshrl.u32 %v59_v26, 15 }
  0x2d   :  { %v63_v30 = vor.u32 %v62_v29, %v61_v28 }
  0x2f   :  { %v64_v31 = vxor.u32 %v63_v30, %v60_v27 }
  0x31   :  { %v65_v32 = vadd.s32 %v64_v31, %v60_v27  ;;  %v66_v33 = vshll.u32 %v64_v31, 29  ;;  %v67_v34 = vshrl.u32 %v64_v31, 3 }
  0x33   :  { %v68_v35 = vor.u32 %v67_v34, %v66_v33 }
  0x35   :  { %v69_v36 = vxor.u32 %v68_v35, %v65_v32 }
  0x37   :  { %v70_v37 = vadd.s32 %v69_v36, %v65_v32  ;;  %v71_v38 = vshll.u32 %v69_v36, 16  ;;  %v72_v39 = vshrl.u32 %v69_v36, 16 }
  0x39   :  { %v73_v40 = vor.u32 %v72_v39, %v71_v38 }
  0x3b   :  { %v74_v41 = vxor.u32 %v73_v40, %v70_v37 }
  0x3d   :  { %v75_v42 = vadd.s32 %v74_v41, %v70_v37  ;;  %v76_v43 = vshll.u32 %v74_v41, 24  ;;  %v77_v44 = vshrl.u32 %v74_v41, 8 }
  0x3f   :  { %v78_v45 = vor.u32 %v77_v44, %v76_v43  ;;  %v80_v47 = vadd.s32 %v75_v42, %v857_v21 }
  0x41   :  { %v79_v46 = vxor.u32 %v78_v45, %v75_v42 }
  0x43   :  { %v82_v48 = vadd.s32 2, %v79_v46 }
  0x45   :  { %v83_v49 = vadd.s32 %v82_v48, %v80_v47  ;;  %v84_v50 = vshll.u32 %v82_v48, 13  ;;  %v85_v51 = vshrl.u32 %v82_v48, 19 }
  0x47   :  { %v86_v52 = vor.u32 %v85_v51, %v84_v50 }
  0x49   :  { %v87_v53 = vxor.u32 %v86_v52, %v83_v49 }
  0x4b   :  { %v88_v54 = vadd.s32 %v87_v53, %v83_v49  ;;  %v89_v55 = vshll.u32 %v87_v53, 15  ;;  %v90_v56 = vshrl.u32 %v87_v53, 17 }
  0x4d   :  { %v91_v57 = vor.u32 %v90_v56, %v89_v55 }
  0x4f   :  { %v92_v58 = vxor.u32 %v91_v57, %v88_v54 }
  0x51   :  { %v93_v59 = vadd.s32 %v92_v58, %v88_v54  ;;  %v94_v60 = vshll.u32 %v92_v58, 26  ;;  %v95_v61 = vshrl.u32 %v92_v58, 6 }
  0x53   :  { %v96_v62 = vor.u32 %v95_v61, %v94_v60 }
  0x55   :  { %v97_v63 = vxor.u32 %v96_v62, %v93_v59 }
  0x57   :  { %v98_v0 = vadd.s32 %v97_v63, %v93_v59  ;;  %v99_v2 = vshll.u32 %v97_v63, 6  ;;  %v100_v3 = vshrl.u32 %v97_v63, 26 }
  0x59   :  { %v101_v4 = vor.u32 %v100_v3, %v99_v2 }
  0x5b   :  { %v102_v5 = vxor.u32 %v101_v4, %v98_v0 }
  0x5d   :  { %v104_v6 = vadd.s32 %v102_v5, %v853_v1 }
  0x5f   :  { %v105_v7 = vadd.s32 3, %v104_v6 }
  0x61   :  { %v106_v8 = vadd.s32 %v105_v7, %v98_v0  ;;  %v107_v9 = vshll.u32 %v105_v7, 17  ;;  %v108_v10 = vshrl.u32 %v105_v7, 15 }
  0x63   :  { %v109_v11 = vor.u32 %v108_v10, %v107_v9 }
  0x65   :  { %v110_v12 = vxor.u32 %v109_v11, %v106_v8 }
  0x67   :  { %v111_v13 = vadd.s32 %v110_v12, %v106_v8  ;;  %v112_v14 = vshll.u32 %v110_v12, 29  ;;  %v113_v15 = vshrl.u32 %v110_v12, 3 }
  0x69   :  { %v114_v16 = vor.u32 %v113_v15, %v112_v14 }
  0x6b   :  { %v115_v17 = vxor.u32 %v114_v16, %v111_v13 }
  0x6d   :  { %v116_v18 = vadd.s32 %v115_v17, %v111_v13  ;;  %v117_v19 = vshll.u32 %v115_v17, 16  ;;  %v118_v20 = vshrl.u32 %v115_v17, 16 }
  0x6f   :  { %v119_v22 = vor.u32 %v118_v20, %v117_v19 }
  0x71   :  { %v120_v23 = vxor.u32 %v119_v22, %v116_v18 }
  0x73   :  { %v121_v24 = vadd.s32 %v120_v23, %v116_v18  ;;  %v122_v25 = vshll.u32 %v120_v23, 24  ;;  %v123_v26 = vshrl.u32 %v120_v23, 8 }
  0x75   :  { %v124_v27 = vor.u32 %v123_v26, %v122_v25  ;;  %v126_v29 = vadd.s32 %v121_v24, %v853_v1 }
  0x77   :  { %v125_v28 = vxor.u32 %v124_v27, %v121_v24 }
  0x79   :  { %v127_v30 = vadd.s32 %v125_v28, %v857_v21 }
  0x7b   :  { %v128_v31 = vadd.s32 4, %v127_v30 }
  0x7d   :  { %v129_v32 = vadd.s32 %v128_v31, %v126_v29  ;;  %v130_v33 = vshll.u32 %v128_v31, 13  ;;  %v131_v34 = vshrl.u32 %v128_v31, 19 }
  0x7f   :  { %v132_v35 = vor.u32 %v131_v34, %v130_v33 }
  0x81   :  { %v133_v36 = vxor.u32 %v132_v35, %v129_v32 }
  0x83   :  { %v134_v37 = vadd.s32 %v133_v36, %v129_v32  ;;  %v135_v38 = vshll.u32 %v133_v36, 15  ;;  %v136_v39 = vshrl.u32 %v133_v36, 17 }
  0x85   :  { %v137_v40 = vor.u32 %v136_v39, %v135_v38 }
  0x87   :  { %v138_v41 = vxor.u32 %v137_v40, %v134_v37 }
  0x89   :  { %v139_v42 = vadd.s32 %v138_v41, %v134_v37  ;;  %v140_v43 = vshll.u32 %v138_v41, 26  ;;  %v141_v44 = vshrl.u32 %v138_v41, 6 }
  0x8b   :  { %v142_v45 = vor.u32 %v141_v44, %v140_v43 }
  0x8d   :  { %v143_v46 = vxor.u32 %v142_v45, %v139_v42 }
  0x8f   :  { %v144_v47 = vadd.s32 %v143_v46, %v139_v42  ;;  %v145_v1 = vshll.u32 %v143_v46, 6  ;;  %v146_v48 = vshrl.u32 %v143_v46, 26 }
  0x91   :  { %v147_v49 = vor.u32 %v146_v48, %v145_v1  ;;  %v149_v51 = vadd.s32 %v144_v47, %v857_v21  ;;  %v820_v48 = vmov 683565275  }
  0x93   :  { %v148_v50 = vxor.u32 %v147_v49, %v144_v47 }
  0x95   :  { %v151_v52 = vadd.s32 5, %v148_v50  ;;  %v821_v50 = vmov 2475754826  }
  0x97   :  { %v152_v53 = vxor.u32 %v151_v52, %v149_v51 }
  0x99   :  { %153 = set.rngseed %v152_v53 }
  0x9a   :  { %v154_v54 = vrng }
  0x9b   :  { %v155_v55 = vrng  ;;  %v158_v0 = vand.u32 8388607, %v154_v54  ;;  %v822_v54 = vmov 2131351028  }
  0x9c   :  { %v156_v56 = vrng  ;;  %v159_v3 = vand.u32 8388607, %v155_v55 }
  0x9d   :  { %v157_v57 = vrng  ;;  %v162_v7 = vor.u32 1065353216, %v158_v0  ;;  %v160_v17 = vand.u32 8388607, %v156_v56 }
  0x9e   :  { %v178_v58 = vrng  ;;  %v163_v9 = vor.u32 1065353216, %v159_v3  ;;  %v161_v18 = vand.u32 8388607, %v157_v57  ;;  %v823_v57 = vmov 2102212464  }
  0x9f   :  { %v182_v59 = vand.u32 8388607, %v178_v58  ;;  %v179_v60 = vrng  ;;  %v695_v16 = vadd.f32 -1.0, %v162_v7  ;;  %v164_v30 = vor.u32 1065353216, %v160_v17  ;;  %v825_v7 = vmov 1326507024  }
  0xa0   :  { %v183_v61 = vand.u32 8388607, %v179_v60  ;;  %v180_v62 = vrng  ;;  %v696_v20 = vadd.f32 -1.0, %v163_v9  ;;  %v165_v33 = vor.u32 1065353216, %v161_v18 }
  0xa1   :  { %v186_v63 = vor.u32 1065353216, %v182_v59  ;;  %v184_v5 = vand.u32 8388607, %v180_v62  ;;  %v181_v14 = vrng  ;;  %v174_v29 = vsub.f32 1.0, %v695_v16  ;;  %v882_v40 = vadd.f32 -1.0, %v164_v30 }
  0xa2   :  { %v187_v2 = vor.u32 1065353216, %v183_v61  ;;  %v185_v24 = vand.u32 8388607, %v181_v14  ;;  %v175_v32 = vsub.f32 1.0, %v696_v20  ;;  %v884_v41 = vadd.f32 -1.0, %v165_v33 }
  0xa3   :  { %v699_v4 = vadd.f32 -1.0, %v186_v63  ;;  %v188_v11 = vor.u32 1065353216, %v184_v5  ;;  %743 = vlog2.f32 %v174_v29  ;;  %v824_v61 = vmov 920167782  }
  0xa4   :  { %v700_v6 = vadd.f32 -1.0, %v187_v2  ;;  %v189_v38 = vor.u32 1065353216, %v185_v24  ;;  %745 = vlog2.f32 %v175_v32 }
  0xa5   :  { %v866_v21 = vmul.f32 6.2831855, %v699_v4  ;;  %v701_v23 = vadd.f32 -1.0, %v188_v11 }
  0xa6   :  { %v868_v8 = vmul.f32 6.2831855, %v700_v6  ;;  %v891_v47 = vadd.f32 -1.0, %v189_v38 }
  0xa7   :  { %v245_v10 = vand.u32 2139095040, %v866_v21  ;;  %v242_v12 = vand.u32 2147483647, %v866_v21  ;;  %v876_v34 = vmul.f32 6.2831855, %v701_v23 }
  0xa8   :  { %v348_v13 = vand.u32 2139095040, %v868_v8  ;;  %v345_v26 = vand.u32 2147483647, %v868_v8 }
  0xa9   :  { %v246_v15 = vshrl.u32 %v245_v10, 23  ;;  %v249_v25 = vand.u32 8388607, %v242_v12  ;;  %v451_v43 = vand.u32 2139095040, %v876_v34  ;;  %v448_v46 = vand.u32 2147483647, %v876_v34 }
  0xaa   :  { %v349_v19 = vshrl.u32 %v348_v13, 23  ;;  %v880_v37 = vand.u32 8388607, %v345_v26 }
  0xab   :  { %v703_v22 = vadd.s32 4294967169, %v246_v15  ;;  %v250_v35 = vor.u32 8388608, %v249_v25  ;;  %v452_v63 = vshrl.u32 %v451_v43, 23 }
  0xac   :  { %v707_v27 = vadd.s32 4294967169, %v349_v19  ;;  %v353_v45 = vor.u32 8388608, %v880_v37 }
  0xad   :  { %v252_v28 = vadd.s32 1, %v703_v22  ;;  %v887_v44 = vshll.u32 %v250_v35, 8 }
  0xae   :  { %v355_v31 = vadd.s32 1, %v707_v27 }
  0xaf   :  { %vm253_vm0 = vcmp.gt.s32.totalorder %v252_v28, 0 }
  0xb0   :  { %v254_v36 = vsel %vm253_vm0, %v252_v28, 0  ;;  %vm356_vm1 = vcmp.gt.s32.totalorder %v355_v31, 0  ;;  %v744_v30 = vpop.eup %743 }
  0xb1   :  { %v256_v39 = vand.u32 31, %v254_v36  ;;  %v255_v1 = vshrl.u32 %v254_v36, 5  ;;  %v357_v52 = vsel %vm356_vm1, %v355_v31, 0  ;;  %v919_v36 = vpop.eup %745  ;;  %vm244_vm1 = vcmp.lt.s32.totalorder %v866_v21, 0 }
  0xb2   :  { %v359_v4 = vand.u32 31, %v357_v52  ;;  %v358_v23 = vshrl.u32 %v357_v52, 5 }
  0xb3   :  { %v257_v42 = vsub.s32 32, %v256_v39  ;;  %v259_v49 = vshll.u32 %v820_v48, %v256_v39  ;;  %v262_v53 = vshll.u32 %v821_v50, %v256_v39  ;;  %v265_v56 = vshll.u32 %v822_v54, %v256_v39 }
  0xb4   :  { %v268_v60 = vshll.u32 %v823_v57, %v256_v39  ;;  %v271_v6 = vshll.u32 %v824_v61, %v256_v39  ;;  %vm274_vm2 = vcmp.lt.s32.totalorder %v255_v1, 1  ;;  %vm275_vm3 = vcmp.lt.s32.totalorder %v255_v1, 2 }
  0xb5   :  { %v260_v51 = vshrl.u32 %v821_v50, %v257_v42  ;;  %v263_v55 = vshrl.u32 %v822_v54, %v257_v42  ;;  %v266_v58 = vshrl.u32 %v823_v57, %v257_v42  ;;  %v269_v62 = vshrl.u32 %v824_v61, %v257_v42 }
  0xb6   :  { %v258_v0 = vshrl.u32 %v820_v48, %v257_v42  ;;  %v272_v9 = vshrl.u32 %v825_v7, %v257_v42  ;;  %vm276_vm4 = vcmp.lt.s32.totalorder %v255_v1, 3  ;;  %vm277_vm5 = vcmp.lt.s32.totalorder %v255_v1, 4 }
  0xb7   :  { %v261_v59 = vor.u32 %v260_v51, %v259_v49  ;;  %v264_v2 = vor.u32 %v263_v55, %v262_v53  ;;  %v267_v3 = vor.u32 %v266_v58, %v265_v56  ;;  %v270_v5 = vor.u32 %v269_v62, %v268_v60 }
  0xb8   :  { %v273_v11 = vor.u32 %v272_v9, %v271_v6  ;;  %v360_v19 = vsub.s32 32, %v359_v4  ;;  %v362_v24 = vshll.u32 %v820_v48, %v359_v4  ;;  %v365_v33 = vshll.u32 %v821_v50, %v359_v4 }
  0xb9   :  { %v282_v10 = vsel %vm274_vm2, %v261_v59, %v264_v2  ;;  %v278_v13 = vsel %vm274_vm2, %v258_v0, %v261_v59  ;;  %v279_v14 = vsel %vm277_vm5, %v267_v3, 2102212464  ;;  %v283_v15 = vsel %vm277_vm5, %v270_v5, 920167782 }
  0xba   :  { %v280_v16 = vsel %vm276_vm4, %v264_v2, %v279_v14  ;;  %v284_v17 = vsel %vm276_vm4, %v267_v3, %v283_v15  ;;  %v286_v18 = vsel %vm274_vm2, %v264_v2, %v267_v3  ;;  %v287_v22 = vsel %vm277_vm5, %v273_v11, 1326507024 }
  0xbb   :  { %v285_v20 = vsel %vm275_vm3, %v282_v10, %v284_v17  ;;  %v281_v25 = vsel %vm275_vm3, %v278_v13, %v280_v16  ;;  %v288_v27 = vsel %vm276_vm4, %v270_v5, %v287_v22  ;;  %v363_v32 = vshrl.u32 %v821_v50, %v360_v19 }
  0xbc   :  { %v911_v28 = vmul.u32.u64.low %v887_v44, %v285_v20  ;;  %v912_v29 = vmul.u32.u64.high %v887_v44, %v285_v20, %v911_v28  ;;  %v289_v31 = vsel %vm275_vm3, %v286_v18, %v288_v27  ;;  %v366_v35 = vshrl.u32 %v822_v54, %v360_v19 }
  0xbd   :  { %v922_v38 = vmul.u32.u64.low %v887_v44, %v289_v31  ;;  %v923_v39 = vmul.u32.u64.high %v887_v44, %v289_v31, %v922_v38  ;;  %v368_v42 = vshll.u32 %v822_v54, %v359_v4  ;;  %v369_v43 = vshrl.u32 %v823_v57, %v360_v19 }
  0xbe   :  { %v364_v49 = vor.u32 %v363_v32, %v362_v24  ;;  %v367_v51 = vor.u32 %v366_v35, %v365_v33  ;;  %v371_v1 = vshll.u32 %v823_v57, %v359_v4  ;;  %v372_v52 = vshrl.u32 %v824_v61, %v360_v19 }
  0xbf   :  { %v300_v53 = vadd.s32 1, %v912_v29  ;;  %v370_v55 = vor.u32 %v369_v43, %v368_v42  ;;  %v374_v56 = vshll.u32 %v824_v61, %v359_v4  ;;  %v375_v58 = vshrl.u32 %v825_v7, %v360_v19 }
  0xc0   :  { %v297_v59 = vmul.u32 %v887_v44, %v281_v25  ;;  %v373_v60 = vor.u32 %v372_v52, %v371_v1  ;;  %v393_v62 = vshll.u32 %v353_v45, 8  ;;  %v711_v0 = vadd.s32 4294967169, %v452_v63 }
  0xc1   :  { %vm299_vm6 = vc.u32 %v923_v39, %v911_v28  ;;  %v376_v2 = vor.u32 %v375_v58, %v374_v56  ;;  %vm377_vm7 = vcmp.lt.s32.totalorder %v358_v23, 1  ;;  %vm380_vm8 = vcmp.lt.s32.totalorder %v358_v23, 4 }
  0xc2   :  { %v301_v3 = vsel %vm299_vm6, %v300_v53, %v912_v29  ;;  %v361_v5 = vshrl.u32 %v820_v48, %v360_v19  ;;  %v382_v4 = vsel %vm380_vm8, %v370_v55, 2102212464  ;;  %v385_v6 = vsel %vm377_vm7, %v364_v49, %v367_v51 }
  0xc3   :  { %v302_v9 = vadd.s32 %v301_v3, %v297_v59  ;;  %vm379_vm9 = vcmp.lt.s32.totalorder %v358_v23, 3  ;;  %v386_v44 = vsel %vm380_vm8, %v373_v60, 920167782  ;;  %v389_v10 = vsel %vm377_vm7, %v367_v51, %v370_v55 }
  0xc4   :  { %vm378_vm10 = vcmp.lt.s32.totalorder %v358_v23, 2  ;;  %v381_v37 = vsel %vm377_vm7, %v361_v5, %v364_v49  ;;  %v387_v45 = vsel %vm379_vm9, %v370_v55, %v386_v44  ;;  %v390_v63 = vsel %vm380_vm8, %v376_v2, 1326507024 }
  0xc5   :  { %v303_v11 = vadd.s32 536870912, %v302_v9  ;;  %v383_v13 = vsel %vm379_vm9, %v367_v51, %v382_v4  ;;  %v388_v14 = vsel %vm378_vm10, %v385_v6, %v387_v45  ;;  %v391_v15 = vsel %vm379_vm9, %v373_v60, %v390_v63 }
  0xc6   :  { %v392_v16 = vsel %vm378_vm10, %v389_v10, %v391_v15  ;;  %v939_v17 = vmul.u32.u64.low %v393_v62, %v388_v14  ;;  %v940_v18 = vmul.u32.u64.high %v393_v62, %v388_v14, %v939_v17  ;;  %v458_v19 = vadd.s32 1, %v711_v0 }
  0xc7   :  { %v943_v20 = vshrl.u32 %v303_v11, 30  ;;  %v945_v22 = vmul.u32.u64.low %v393_v62, %v392_v16  ;;  %v946_v24 = vmul.u32.u64.high %v393_v62, %v392_v16, %v945_v22  ;;  %v455_v23 = vand.u32 8388607, %v448_v46 }
  0xc8   :  { %v384_v25 = vsel %vm378_vm10, %v381_v37, %v383_v13  ;;  %vm459_vm11 = vcmp.gt.s32.totalorder %v458_v19, 0  ;;  %v176_v27 = vsub.f32 1.0, %v882_v40  ;;  %v177_v29 = vsub.f32 1.0, %v884_v41 }
  0xc9   :  { %v305_v31 = vshll.u32 %v943_v20, 30  ;;  %v460_v32 = vsel %vm459_vm11, %v458_v19, 0  ;;  %v199_v33 = vmul.f32 0.6931472, %v744_v30  ;;  %v403_v35 = vadd.s32 1, %v940_v18 }
  0xca   :  { %v462_v38 = vand.u32 31, %v460_v32  ;;  %v955_v42 = vmul.f32 6.2831855, %v891_v47  ;;  %v400_v49 = vmul.u32 %v393_v62, %v384_v25  ;;  %vm402_vm12 = vc.u32 %v946_v24, %v939_v17 }
  0xcb   :  { %v957_v43 = vsub.s32 %v302_v9, %v305_v31  ;;  %v456_v51 = vor.u32 8388608, %v455_v23  ;;  %v404_v40 = vsel %vm402_vm12, %v403_v35, %v940_v18  ;;  %747 = vlog2.f32 %v176_v27 }
  0xcc   :  { %v463_v41 = vsub.s32 32, %v462_v38  ;;  %v405_v30 = vadd.s32 %v404_v40, %v400_v49  ;;  %v963_v52 = vmul.f32 -2.0, %v199_v33  ;;  %v201_v53 = vmul.f32 0.6931472, %v919_v36 }
  0xcd   :  { %v308_v1 = vsub.s32 0, %v957_v43  ;;  %749 = vlog2.f32 %v177_v29  ;;  %v298_v47 = vadd.s32 %v911_v28, %v923_v39  ;;  %v969_v56 = vshll.u32 %v456_v51, 8 }
  0xce   :  { %v554_v58 = vand.u32 2139095040, %v955_v42  ;;  %v406_v59 = vadd.s32 536870912, %v405_v30  ;;  %v466_v60 = vshrl.u32 %v821_v50, %v463_v41  ;;  %v469_v62 = vshrl.u32 %v822_v54, %v463_v41 }
  0xcf   :  { %v704_v55 = vmin.u32 %v308_v1, %v957_v43  ;;  %v472_v0 = vshrl.u32 %v823_v57, %v463_v41  ;;  %v461_v3 = vshrl.u32 %v460_v32, 5  ;;  %v471_v36 = vshll.u32 %v822_v54, %v462_v38 }
  0xd0   :  { %v475_v5 = vshrl.u32 %v824_v61, %v463_v41  ;;  %v977_v28 = vshrl.u32 %v406_v59, 30  ;;  %v465_v39 = vshll.u32 %v820_v48, %v462_v38  ;;  %v468_v4 = vshll.u32 %v821_v50, %v462_v38 }
  0xd1   :  { %v310_v2 = vclz %v704_v55  ;;  %v474_v6 = vshll.u32 %v823_v57, %v462_v38  ;;  %v473_v44 = vor.u32 %v472_v0, %v471_v36  ;;  %v478_v10 = vshrl.u32 %v825_v7, %v463_v41 }
  0xd2   :  { %v555_v37 = vshrl.u32 %v554_v58, 23  ;;  %v408_v45 = vshll.u32 %v977_v28, 30  ;;  %v467_v63 = vor.u32 %v466_v60, %v465_v39  ;;  %v470_v11 = vor.u32 %v469_v62, %v468_v4 }
  0xd3   :  { %v705_v9 = vadd.s32 4294967294, %v310_v2  ;;  %v476_v13 = vor.u32 %v475_v5, %v474_v6  ;;  %v464_v14 = vshrl.u32 %v820_v48, %v463_v41  ;;  %v477_v15 = vshll.u32 %v824_v61, %v462_v38 }
  0xd4   :  { %vm480_vm14 = vcmp.lt.s32.totalorder %v461_v3, 1  ;;  %v986_v18 = vsub.s32 %v405_v30, %v408_v45  ;;  %vm481_vm15 = vcmp.lt.s32.totalorder %v461_v3, 2  ;;  %vm483_vm0 = vcmp.lt.s32.totalorder %v461_v3, 4 }
  0xd5   :  { %vm706_vm13 = vcmp.lt.s32.totalorder %v705_v9, 0  ;;  %v479_v23 = vor.u32 %v478_v10, %v477_v15  ;;  %v485_v25 = vsel %vm483_vm0, %v473_v44, 2102212464  ;;  %vm482_vm2 = vcmp.lt.s32.totalorder %v461_v3, 3 }
  0xd6   :  { %v313_v16 = vsel %vm706_vm13, 0, %v705_v9  ;;  %v411_v27 = vsub.s32 0, %v986_v18  ;;  %v488_v29 = vsel %vm480_vm14, %v467_v63, %v470_v11  ;;  %v489_v31 = vsel %vm483_vm0, %v476_v13, 920167782 }
  0xd7   :  { %v314_v19 = vsub.s32 32, %v313_v16  ;;  %v318_v22 = vsub.s32 4294967266, %v313_v16  ;;  %v315_v32 = vshll.u32 %v957_v43, %v313_v16  ;;  %v490_v38 = vsel %vm482_vm2, %v473_v44, %v489_v31 }
  0xd8   :  { %v748_v49 = vpop.eup %747  ;;  %v708_v51 = vmin.u32 %v411_v27, %v986_v18  ;;  %v484_v40 = vsel %vm480_vm14, %v464_v14, %v467_v63  ;;  %v486_v41 = vsel %vm482_vm2, %v470_v11, %v485_v25  ;;  %v492_v1 = vsel %vm480_vm14, %v470_v11, %v473_v44 }
  0xd9   :  { %v316_v33 = vshrl.u32 %v298_v47, %v314_v19  ;;  %v319_v35 = vadd.s32 127, %v318_v22  ;;  %v491_v59 = vsel %vm481_vm15, %v488_v29, %v490_v38  ;;  %v493_v43 = vsel %vm483_vm0, %v479_v23, 1326507024 }
  0xda   :  { %v999_v30 = vpop.eup %749  ;;  %vm1005_vm3 = vcmp.le.f32.partialorder %v242_v12, 0.7853982  ;;  %v413_v60 = vclz %v708_v51  ;;  %v494_v62 = vsel %vm482_vm2, %v476_v13, %v493_v43  ;;  %v1015_v36 = vmul.f32 -2.0, %v201_v53 }
  0xdb   :  { %v317_v55 = vor.u32 %v316_v33, %v315_v32  ;;  %v320_v58 = vshll.u32 %v319_v35, 23  ;;  %v1011_v0 = vmul.u32.u64.low %v969_v56, %v491_v59  ;;  %v1012_v2 = vmul.u32.u64.high %v969_v56, %v491_v59, %v1011_v0 }
  0xdc   :  { %v328_v39 = vsub.s32 4, %v943_v20  ;;  %v495_v4 = vsel %vm481_vm15, %v492_v1, %v494_v62  ;;  %v709_v6 = vadd.s32 4294967294, %v413_v60  ;;  %v715_v44 = vadd.s32 4294967169, %v555_v37 }
  0xdd   :  { %v321_v5 = vor.u32 4788187, %v320_v58  ;;  %v1020_v12 = vmul.u32.u64.low %v969_v56, %v495_v4  ;;  %v1021_v9 = vmul.u32.u64.high %v969_v56, %v495_v4, %v1020_v12  ;;  %v324_v45 = vcvt.s32.f32 %v317_v55 }
  0xde   :  { %v487_v63 = vsel %vm481_vm15, %v484_v40, %v486_v41  ;;  %v551_v11 = vand.u32 2147483647, %v955_v42  ;;  %751 = vrsqrt.f32 %v963_v52  ;;  %vm710_vm4 = vcmp.lt.s32.totalorder %v709_v6, 0 }
  0xdf   :  { %v322_v10 = vand.u32 2147483647, %v321_v5  ;;  %v506_v53 = vadd.s32 1, %v1012_v2  ;;  %v561_v13 = vadd.s32 1, %v715_v44  ;;  %753 = vrsqrt.f32 %v1015_v36 }
  0xe0   :  { %v329_v15 = vsel %vm244_vm1, %v328_v39, %v943_v20  ;;  %v416_v37 = vsel %vm710_vm4, 0, %v709_v6  ;;  %v401_v3 = vadd.s32 %v939_v17, %v946_v24  ;;  %v503_v22 = vmul.u32 %v969_v56, %v487_v63 }
  0xe1   :  { %v325_v14 = vmul.f32 %v324_v45, %v322_v10  ;;  %v417_v16 = vsub.s32 32, %v416_v37  ;;  %v421_v19 = vsub.s32 4294967266, %v416_v37  ;;  %v418_v25 = vshll.u32 %v986_v18, %v416_v37 }
  0xe2   :  { %vm505_vm5 = vc.u32 %v1021_v9, %v1011_v0  ;;  %vm562_vm6 = vcmp.gt.s32.totalorder %v561_v13, 0  ;;  %v331_v17 = vsel %vm1005_vm3, 0, %v329_v15  ;;  %v558_v38 = vand.u32 8388607, %v551_v11 }
  0xe3   :  { %v326_v23 = vxor.u32 2147483648, %v325_v14  ;;  %v419_v27 = vshrl.u32 %v401_v3, %v417_v16  ;;  %v422_v29 = vadd.s32 127, %v421_v19  ;;  %v507_v31 = vsel %vm505_vm5, %v506_v53, %v1012_v2 }
  0xe4   :  { %v563_v20 = vsel %vm562_vm6, %v561_v13, 0  ;;  %v508_v24 = vadd.s32 %v507_v31, %v503_v22  ;;  %vm347_vm7 = vcmp.lt.s32.totalorder %v868_v8, 0  ;;  %v1048_v41 = vmul.f32 0.6931472, %v748_v49 }
  0xe5   :  { %v327_v32 = vsel %vm244_vm1, %v326_v23, %v325_v14  ;;  %v565_v56 = vand.u32 31, %v563_v20  ;;  %v420_v33 = vor.u32 %v419_v27, %v418_v25  ;;  %v423_v35 = vshll.u32 %v422_v29, 23 }
  0xe6   :  { %v330_v18 = vsel %vm1005_vm3, %v866_v21, %v327_v32  ;;  %v509_v51 = vadd.s32 536870912, %v508_v24  ;;  %v1050_v1 = vand.u32 3, %v331_v17  ;;  %vm1054_vm8 = vcmp.le.f32.partialorder %v345_v26, 0.7853982 }
  0xe7   :  { %755 = vcosq.f32 %v330_v18  ;;  %v566_v40 = vsub.s32 32, %v565_v56  ;;  %v424_v58 = vor.u32 4788187, %v423_v35  ;;  %v431_v59 = vsub.s32 4, %v977_v28 }
  0xe8   :  { %757 = vsinq.f32 %v330_v18  ;;  %v1059_v43 = vshrl.u32 %v509_v51, 30  ;;  %v427_v62 = vcvt.s32.f32 %v420_v33  ;;  %v559_v2 = vor.u32 8388608, %v558_v38 }
  0xe9   :  { %v569_v47 = vshrl.u32 %v821_v50, %v566_v40  ;;  %v572_v60 = vshrl.u32 %v822_v54, %v566_v40  ;;  %v425_v49 = vand.u32 2147483647, %v424_v58  ;;  %v575_v5 = vshrl.u32 %v823_v57, %v566_v40 }
  0xea   :  { %v511_v39 = vshll.u32 %v1059_v43, 30  ;;  %v564_v26 = vshrl.u32 %v563_v20, 5  ;;  %v568_v4 = vshll.u32 %v820_v48, %v565_v56  ;;  %v571_v6 = vshll.u32 %v821_v50, %v565_v56 }
  0xeb   :  { %v428_v12 = vmul.f32 %v427_v62, %v425_v49  ;;  %v574_v44 = vshll.u32 %v822_v54, %v565_v56  ;;  %v577_v10 = vshll.u32 %v823_v57, %v565_v56  ;;  %v578_v45 = vshrl.u32 %v824_v61, %v566_v40  ;;  %v752_v63 = vpop.eup %751 }
  0xec   :  { %v1070_v53 = vsub.s32 %v508_v24, %v511_v39  ;;  %v570_v13 = vor.u32 %v569_v47, %v568_v4  ;;  %v573_v14 = vor.u32 %v572_v60, %v571_v6  ;;  %v581_v15 = vshrl.u32 %v825_v7, %v566_v40  ;;  %v1073_v37 = vpop.eup %753 }
  0xed   :  { %v429_v3 = vxor.u32 2147483648, %v428_v12  ;;  %v576_v16 = vor.u32 %v575_v5, %v574_v44  ;;  %v579_v19 = vor.u32 %v578_v45, %v577_v10  ;;  %v580_v50 = vshll.u32 %v824_v61, %v565_v56 }
  0xee   :  { %v432_v54 = vsel %vm347_vm7, %v431_v59, %v977_v28  ;;  %v514_v57 = vsub.s32 0, %v1070_v53  ;;  %v567_v22 = vshrl.u32 %v820_v48, %v566_v40  ;;  %v599_v23 = vshll.u32 %v559_v2, 8 }
  0xef   :  { %vm337_vm9 = vcmp.eq.s32.totalorder %v1050_v1, 0  ;;  %v430_v7 = vsel %vm347_vm7, %v429_v3, %v428_v12  ;;  %v582_v25 = vor.u32 %v581_v15, %v580_v50  ;;  %vm583_vm10 = vcmp.lt.s32.totalorder %v564_v26, 1 }
  0xf0   :  { %vm584_vm11 = vcmp.lt.s32.totalorder %v564_v26, 2  ;;  %v433_v61 = vsel %vm1054_vm8, %v868_v8, %v430_v7  ;;  %v712_v27 = vmin.u32 %v514_v57, %v1070_v53  ;;  %vm586_vm12 = vcmp.lt.s32.totalorder %v564_v26, 4 }
  0xf1   :  { %v591_v28 = vsel %vm583_vm10, %v570_v13, %v573_v14  ;;  %759 = vcosq.f32 %v433_v61  ;;  %vm585_vm13 = vcmp.lt.s32.totalorder %v564_v26, 3  ;;  %v588_v48 = vsel %vm586_vm12, %v576_v16, 2102212464 }
  0xf2   :  { %v592_v29 = vsel %vm586_vm12, %v579_v19, 920167782  ;;  %761 = vsinq.f32 %v433_v61  ;;  %v516_v31 = vclz %v712_v27  ;;  %v587_v20 = vsel %vm583_vm10, %v567_v22, %v570_v13 }
  0xf3   :  { %v593_v32 = vsel %vm585_vm13, %v576_v16, %v592_v29  ;;  %v589_v24 = vsel %vm585_vm13, %v573_v14, %v588_v48  ;;  %v595_v18 = vsel %vm583_vm10, %v573_v14, %v576_v16  ;;  %v596_v33 = vsel %vm586_vm12, %v582_v25, 1326507024 }
  0xf4   :  { %v756_v17 = vpop.eup %755  ;;  %v594_v56 = vsel %vm584_vm11, %v591_v28, %v593_v32  ;;  %v434_v51 = vsel %vm1054_vm8, 0, %v432_v54  ;;  %v713_v40 = vadd.s32 4294967294, %v516_v31  ;;  %v597_v58 = vsel %vm585_vm13, %v579_v19, %v596_v33 }
  0xf5   :  { %v758_v35 = vpop.eup %757  ;;  %v341_v38 = vxor.u32 2147483648, %v756_v17  ;;  %vm334_vm14 = vweird.f32 %v866_v21  ;;  %v598_v47 = vsel %vm584_vm11, %v595_v18, %v597_v58  ;;  %v590_v62 = vsel %vm584_vm11, %v587_v20, %v589_v24 }
  0xf6   :  { %v338_v59 = vxor.u32 2147483648, %v758_v35  ;;  %v1099_v60 = vmul.u32.u64.low %v599_v23, %v594_v56  ;;  %v1100_v49 = vmul.u32.u64.high %v599_v23, %v594_v56, %v1099_v60  ;;  %vm714_vm15 = vcmp.lt.s32.totalorder %v713_v40, 0 }
  0xf7   :  { %v1104_v2 = vmul.u32.u64.low %v599_v23, %v598_v47  ;;  %v1105_v5 = vmul.u32.u64.high %v599_v23, %v598_v47, %v1104_v2  ;;  %vm340_vm0 = vcmp.eq.s32.totalorder %v1050_v1, 2  ;;  %v504_v55 = vadd.s32 %v1011_v0, %v1021_v9 }
  0xf8   :  { %v519_v39 = vsel %vm714_vm15, 0, %v713_v40  ;;  %v211_v4 = vmul.f32 %v752_v63, %v963_v52  ;;  %v339_v6 = vsel %vm337_vm9, %v756_v17, %v338_v59  ;;  %v342_v12 = vsel %vm340_vm0, %v341_v38, %v758_v35  ;;  %v658_v40 = vld [vmem:[#allocation4] sm:$0xff] }
  0xf9   :  { %v520_v44 = vsub.s32 32, %v519_v39  ;;  %v524_v10 = vsub.s32 4294967266, %v519_v39  ;;  %vm336_vm1 = vcmp.lt.s32.totalorder %v1050_v1, 2  ;;  %v438_v26 = vand.u32 3, %v434_v51 }
  0xfa   :  { %v606_v45 = vmul.u32 %v599_v23, %v590_v62  ;;  %v609_v13 = vadd.s32 1, %v1100_v49  ;;  %v521_v14 = vshll.u32 %v1070_v53, %v519_v39  ;;  %vm608_vm2 = vc.u32 %v1105_v5, %v1099_v60  ;;  %v659_v39 = vld [vmem:[#allocation4 + $0x8] sm:$0xff] }
  0xfb   :  { %v522_v15 = vshrl.u32 %v504_v55, %v520_v44  ;;  %v525_v3 = vadd.s32 127, %v524_v10  ;;  %v1119_v0 = vmul.f32 -2.0, %v1048_v41  ;;  %v343_v9 = vsel %vm336_vm1, %v339_v6, %v342_v12 }
  0xfc   :  { %vm437_vm3 = vweird.f32 %v868_v8  ;;  %v610_v63 = vsel %vm608_vm2, %v609_v13, %v1100_v49  ;;  %vm212_vm4 = vcmp.eq.f32.partialorder %v963_v52, inf  ;;  %vm439_vm5 = vcmp.lt.s32.totalorder %v438_v26, 2 }
  0xfd   :  { %v523_v1 = vor.u32 %v522_v15, %v521_v14  ;;  %v526_v16 = vshll.u32 %v525_v3, 23  ;;  %v611_v19 = vadd.s32 %v610_v63, %v606_v45  ;;  %v213_v53 = vsel %vm212_vm4, %v963_v52, %v211_v4 }
  0xfe   :  { %vm440_vm6 = vcmp.eq.s32.totalorder %v438_v26, 0  ;;  %v215_v50 = vand.u32 2147483648, %v963_v52  ;;  %v218_v41 = vmul.f32 %v1073_v37, %v1015_v36  ;;  %v760_v54 = vpop.eup %759  ;;  %v344_v57 = vsel %vm334_vm14, nan, %v343_v9 }
  0xff   :  { %v527_v22 = vor.u32 4788187, %v526_v16  ;;  %v612_v23 = vadd.s32 536870912, %v611_v19  ;;  %vm214_vm7 = vcmp.eq.f32.partialorder %v963_v52, 0.0  ;;  %v762_v7 = vpop.eup %761  ;;  %vm443_vm8 = vcmp.eq.s32.totalorder %v438_v26, 2 }
 0x100   :  { %v444_v25 = vxor.u32 2147483648, %v760_v54  ;;  %v216_v61 = vsel %vm214_vm7, %v215_v50, %v213_v53  ;;  %vm219_vm9 = vcmp.eq.f32.partialorder %v1015_v36, inf  ;;  %v441_v27 = vxor.u32 2147483648, %v762_v7 }
 0x101   :  { %v528_v28 = vand.u32 2147483647, %v527_v22  ;;  %v530_v48 = vcvt.s32.f32 %v523_v1  ;;  %v1132_v29 = vshrl.u32 %v612_v23, 30  ;;  %v220_v31 = vsel %vm219_vm9, %v1015_v36, %v218_v41 }
 0x102   :  { %v445_v37 = vsel %vm443_vm8, %v444_v25, %v762_v7  ;;  %v654_v21 = vmul.f32 %v344_v57, %v216_v61  ;;  %v1138_v20 = vstv %s1190_s1  ;;  %v442_v52 = vsel %vm440_vm6, %v760_v54, %v441_v27  ;;  %s826_s1 = smov [#allocation7]  }
 0x103   :  { %v531_v32 = vmul.f32 %v530_v48, %v528_v28  ;;  %v614_v17 = vshll.u32 %v1132_v29, 30  ;;  %v222_v24 = vand.u32 2147483648, %v1015_v36  ;;  %763 = vrsqrt.f32 %v1119_v0  ;;  %s686_s19 = sshll.u32 %s826_s1, 4  ;;  %s687_s19 = int_to_ptr.vmem [resolvable:$true] %s686_s19 }
 0x104   :  { %v446_v56 = vsel %vm439_vm5, %v442_v52, %v445_v37  ;;  %vm221_vm10 = vcmp.eq.f32.partialorder %v1015_v36, 0.0  ;;  %v664_v18 = vmul.f32 %v1138_v20, %v654_v21  ;;  %vm450_vm11 = vcmp.lt.s32.totalorder %v876_v34, 0  ;;  %s795_s20 = scalar_lea.vmem %s687_s19, 512  ;;  %p800_p6 = scmp.lt.s32.totalorder %s687_s19, %s687_s19 }
 0x105   :  { %v447_v33 = vsel %vm437_vm3, nan, %v446_v56  ;;  %v532_v35 = vxor.u32 2147483648, %v531_v32  ;;  %v615_v38 = vsub.s32 %v611_v19, %v614_v17  ;;  %v223_v51 = vsel %vm221_vm10, %v222_v24, %v220_v31  ;;  %p796_p5 = scmp.ne.s32.totalorder %s687_s19, %s795_s20  ;;  %p801_p7 = scmp.lt.s32.totalorder %s795_s20, %s795_s20 }
 0x106   :  { %v655_v58 = vmul.f32 %v447_v33, %v223_v51  ;;  %v668_v59 = vadd.f32 1.0, %v664_v18  ;;  %vm1152_vm12 = vcmp.le.f32.partialorder %v448_v46, 0.7853982  ;;  %v534_v4 = vsub.s32 4, %v1059_v43 }
 0x107   :  { %v533_v36 = vsel %vm450_vm11, %v532_v35, %v531_v32  ;;  %v617_v49 = vsub.s32 0, %v615_v38  ;;  %v607_v14 = vadd.s32 %v1099_v60, %v1105_v5  ;;  %v205_v9 = vmul.f32 0.6931472, %v999_v30  ;;  %p802_p8 = por %p801_p7, %p800_p6 }
 0x108   :  { %v536_v8 = vsel %vm1152_vm12, %v876_v34, %v533_v36  ;;  %v665_v62 = vmul.f32 %v1138_v20, %v655_v58  ;;  %v672_v2 = vmul.f32 %v668_v59, %v658_v40  ;;  %v535_v10 = vsel %vm450_vm11, %v534_v4, %v1059_v43 }
 0x109   :  { %765 = vcosq.f32 %v536_v8  ;;  %v716_v55 = vmin.u32 %v617_v49, %v615_v38  ;;  %v537_v13 = vsel %vm1152_vm12, 0, %v535_v10  ;;  %v209_v57 = vmul.f32 -2.0, %v205_v9  ;;  %p803_p9 = pnand %p802_p8, %p796_p5 }
 0x10a   :  { %767 = vsinq.f32 %v536_v8  ;;  %v669_v46 = vadd.f32 1.0, %v665_v62  ;;  %676 = vst [vmem:[#allocation7] sm:$0xff] %v672_v2  ;;  %v541_v19 = vand.u32 3, %v537_v13  ;;  %vm226_vm0 = vcmp.eq.f32.partialorder %v1119_v0, inf }
 0x10b   :  { %v619_v6 = vclz %v716_v55  ;;  %v229_v27 = vand.u32 2147483648, %v1119_v0  ;;  %vm540_vm2 = vweird.f32 %v876_v34  ;;  %vm228_vm3 = vcmp.eq.f32.partialorder %v1119_v0, 0.0  ;;  %v660_v34 = vld [vmem:[#allocation4 + $0x10] sm:$0xff] }
 0x10c   :  { %v673_v12 = vmul.f32 %v669_v46, %v659_v39  ;;  %vm543_vm14 = vcmp.eq.s32.totalorder %v541_v19, 0  ;;  %vm546_vm15 = vcmp.eq.s32.totalorder %v541_v19, 2  ;;  %vm542_vm1 = vcmp.lt.s32.totalorder %v541_v19, 2  ;;  %v661_v46 = vld [vmem:[#allocation4 + $0x18] sm:$0xff] }
 0x10d   :  { %v717_v44 = vadd.s32 4294967294, %v619_v6  ;;  %769 = vrsqrt.f32 %v209_v57  ;;  %vm553_vm4 = vcmp.lt.s32.totalorder %v955_v42, 0  ;;  %vm552_vm5 = vcmp.le.f32.partialorder %v551_v11, 0.7853982 }
 0x10e   :  { %677 = vst [vmem:[#allocation7 + $0x8] sm:$0xff] %v673_v12  ;;  %vm233_vm7 = vcmp.eq.f32.partialorder %v209_v57, inf  ;;  %v236_v62 = vand.u32 2147483648, %v209_v57  ;;  %vm643_vm10 = vweird.f32 %v955_v42  ;;  %vm235_vm11 = vcmp.eq.f32.partialorder %v209_v57, 0.0 }
 0x10f   :  { %vm718_vm13 = vcmp.lt.s32.totalorder %v717_v44, 0 }
 0x110   :  { %v622_v26 = vsel %vm718_vm13, 0, %v717_v44  ;;  %v764_v45 = vpop.eup %763 }
 0x111   :  { %v623_v15 = vsub.s32 32, %v622_v26  ;;  %v627_v3 = vsub.s32 4294967266, %v622_v26  ;;  %v624_v63 = vshll.u32 %v615_v38, %v622_v26  ;;  %v225_v50 = vmul.f32 %v764_v45, %v1119_v0 }
 0x113   :  { %v625_v1 = vshrl.u32 %v607_v14, %v623_v15  ;;  %v628_v16 = vadd.s32 127, %v627_v3  ;;  %v227_v25 = vsel %vm226_vm0, %v1119_v0, %v225_v50  ;;  %v637_v0 = vsub.s32 4, %v1132_v29 }
 0x114   :  { %v230_v31 = vsel %vm228_vm3, %v229_v27, %v227_v25 }
 0x115   :  { %v626_v53 = vor.u32 %v625_v1, %v624_v63  ;;  %v629_v43 = vshll.u32 %v628_v16, 23  ;;  %v638_v33 = vsel %vm553_vm4, %v637_v0, %v1132_v29 }
 0x116   :  { %v766_v41 = vpop.eup %765  ;;  %v640_v35 = vsel %vm552_vm5, 0, %v638_v33 }
 0x117   :  { %v768_v54 = vpop.eup %767  ;;  %v547_v22 = vxor.u32 2147483648, %v766_v41  ;;  %v630_v23 = vor.u32 4788187, %v629_v43  ;;  %v633_v5 = vcvt.s32.f32 %v626_v53  ;;  %v644_v51 = vand.u32 3, %v640_v35 }
 0x118   :  { %v544_v7 = vxor.u32 2147483648, %v768_v54 }
 0x119   :  { %v548_v60 = vsel %vm546_vm15, %v547_v22, %v768_v54  ;;  %v631_v30 = vand.u32 2147483647, %v630_v23  ;;  %vm649_vm6 = vcmp.eq.s32.totalorder %v644_v51, 2  ;;  %vm646_vm8 = vcmp.eq.s32.totalorder %v644_v51, 0 }
 0x11a   :  { %v545_v61 = vsel %vm543_vm14, %v766_v41, %v544_v7  ;;  %v770_v38 = vpop.eup %769  ;;  %vm645_vm9 = vcmp.lt.s32.totalorder %v644_v51, 2 }
 0x11b   :  { %v549_v28 = vsel %vm542_vm1, %v545_v61, %v548_v60  ;;  %v634_v48 = vmul.f32 %v633_v5, %v631_v30  ;;  %v232_v40 = vmul.f32 %v770_v38, %v209_v57 }
 0x11c   :  { %v550_v37 = vsel %vm540_vm2, nan, %v549_v28 }
 0x11d   :  { %v635_v21 = vxor.u32 2147483648, %v634_v48  ;;  %v656_v52 = vmul.f32 %v550_v37, %v230_v31  ;;  %v234_v49 = vsel %vm233_vm7, %v209_v57, %v232_v40 }
 0x11e   :  { %v237_v55 = vsel %vm235_vm11, %v236_v62, %v234_v49 }
 0x11f   :  { %v636_v32 = vsel %vm553_vm4, %v635_v21, %v634_v48  ;;  %v666_v17 = vmul.f32 %v1138_v20, %v656_v52 }
 0x120   :  { %v639_v24 = vsel %vm552_vm5, %v955_v42, %v636_v32 }
 0x121   :  { %771 = vcosq.f32 %v639_v24  ;;  %v670_v56 = vadd.f32 1.0, %v666_v17 }
 0x122   :  { %773 = vsinq.f32 %v639_v24 }
 0x123   :  { %v674_v18 = vmul.f32 %v670_v56, %v660_v34 }
 0x125   :  { %678 = vst [vmem:[#allocation7 + $0x10] sm:$0xff] %v674_v18 }
 0x12e   :  { %v772_v11 = vpop.eup %771 }
 0x12f   :  { %v774_v58 = vpop.eup %773  ;;  %v650_v59 = vxor.u32 2147483648, %v772_v11 }
 0x130   :  { %v647_v47 = vxor.u32 2147483648, %v774_v58 }
 0x131   :  { %v651_v36 = vsel %vm649_vm6, %v650_v59, %v774_v58 }
 0x132   :  { %v648_v8 = vsel %vm646_vm8, %v772_v11, %v647_v47 }
 0x133   :  { %v652_v2 = vsel %vm645_vm9, %v648_v8, %v651_v36 }
 0x134   :  { %v653_v29 = vsel %vm643_vm10, nan, %v652_v2 }
 0x135   :  { %v657_v39 = vmul.f32 %v653_v29, %v237_v55 }
 0x137   :  { %v667_v4 = vmul.f32 %v1138_v20, %v657_v39 }
 0x139   :  { %v671_v6 = vadd.f32 1.0, %v667_v4 }
 0x13b   :  { %v675_v12 = vmul.f32 %v671_v6, %v661_v46 }
 0x13d   :  { %679 = vst [vmem:[#allocation7 + $0x18] sm:$0xff] %v675_v12 }
 0x13e   :  { %806 = shalt.err (!%p803_p9)
}
 0x13f   :  { %689 = dma.vmem_to_hbm [thread:$0]  %s687_s19, 512, %s1192_s3, [#allocation6]  }
 0x140   :  { %817 = dma.done.wait [#allocation6], 512  }
 0x141   :  { %818 = vsyncadd [#allocation6], 4294966784 }
 0x142   :  { %693 = vsyncpa [#allocation5], 1 }
 0x143   :  { %694 = vsyncpa [#allocation6], 1 }

// kernel: tpu_custom_call.1
= control target key start
LH: loop header
LB: loop body
LE: loop exit
PB: predicated region body
PF: predicated region fallthrough
CT: control target
= control target key end

     0   :  { %9 = vsyncpa [#allocation4], 0  ;;  %s295_s0 = inlined_call_operand.<no memory space> [shape: f32[1], index: 0, kind: input, shape index: {}]   ;;  %s296_s1 = inlined_call_operand.hbm [shape: f32[32,512], index: 1, kind: input, shape index: {}]   ;;  %s297_s2 = inlined_call_operand.hbm [shape: f32[32,512], index: 2, kind: input, shape index: {}]   ;;  %s298_s3 = inlined_call_operand.hbm [shape: f32[32,512], index: 3, kind: output, shape index: {}]  }
   0x1   :  { %10 = vsyncpa [#allocation7], 0 }
   0x2   :  { %11 = vsyncpa [#allocation5], 0  ;;  %s231_s12 = smov [#allocation3]  }
   0x3   :  { %s19_s13 = sshll.u32 %s231_s12, 4  ;;  %s20_s13 = int_to_ptr.vmem [resolvable:$true] %s19_s13 }
   0x4   :  { %s173_s14 = scalar_lea.vmem %s20_s13, 2048  ;;  %p178_p1 = scmp.lt.s32.totalorder %s20_s13, %s20_s13 }
   0x5   :  { %p174_p0 = scmp.ne.s32.totalorder %s20_s13, %s173_s14  ;;  %p179_p2 = scmp.lt.s32.totalorder %s173_s14, %s173_s14 }
   0x7   :  { %p180_p3 = por %p179_p2, %p178_p1 }
   0x9   :  { %p181_p4 = pnand %p180_p3, %p174_p0 }
   0xb   :  { %184 = shalt.err (!%p181_p4)
}
   0xc   :  { %s232_s15 = smov 512   ;;  %s233_s16 = smov 32  }
   0xd   :  { %25 = dma.hbm_to_vmem [thread:$0]  %s296_s1, 2048, %s20_s13, [#allocation4], %s232_s15, %s232_s15, %s233_s16  }
   0xe   :  { %s234_s19 = smov [#allocation6]  }
   0xf   :  { %s31_s20 = sshll.u32 %s234_s19, 4  ;;  %s32_s20 = int_to_ptr.vmem [resolvable:$true] %s31_s20 }
  0x10   :  { %s193_s21 = scalar_lea.vmem %s32_s20, 2048  ;;  %p198_p6 = scmp.lt.s32.totalorder %s32_s20, %s32_s20 }
  0x11   :  { %p194_p5 = scmp.ne.s32.totalorder %s32_s20, %s193_s21  ;;  %p199_p7 = scmp.lt.s32.totalorder %s193_s21, %s193_s21 }
  0x13   :  { %p200_p8 = por %p199_p7, %p198_p6 }
  0x15   :  { %p201_p9 = pnand %p200_p8, %p194_p5 }
  0x17   :  { %204 = shalt.err (!%p201_p9)
}
  0x18   :  { %37 = dma.hbm_to_vmem [thread:$0]  %s297_s2, 2048, %s32_s20, [#allocation7], %s232_s15, %s232_s15, %s233_s16  }
  0x19   :  { %225 = dma.done.wait [#allocation4], 2048  }
  0x1a   :  { %226 = vsyncadd [#allocation4], 4294965248 }
  0x1b   :  { %227 = dma.done.wait [#allocation7], 2048  }
  0x1c   :  { %228 = vsyncadd [#allocation7], 4294965248  ;;  %v271_v0 = vstv %s295_s0  ;;  %v61_v1 = vld [vmem:[#allocation6] sm:$0xff]  ;;  %v62_v3 = vld [vmem:[#allocation6 + $0x8] sm:$0xff]  ;;  %s235_s0 = smov [#allocation8]  }
  0x1d   :  { %v78_v2 = vmul.f32 %v271_v0, %v61_v1  ;;  %v63_v4 = vld [vmem:[#allocation6 + $0x10] sm:$0xff]  ;;  %v44_v5 = vld [vmem:[#allocation3] sm:$0xff]  ;;  %v45_v6 = vld [vmem:[#allocation3 + $0x8] sm:$0xff]  ;;  %v79_v7 = vmul.f32 %v271_v0, %v62_v3  ;;  %s147_s2 = sshll.u32 %s235_s0, 4  ;;  %s148_s2 = int_to_ptr.vmem [resolvable:$true] %s147_s2 }
  0x1e   :  { %v80_v8 = vmul.f32 %v271_v0, %v63_v4  ;;  %v64_v9 = vld [vmem:[#allocation6 + $0x18] sm:$0xff]  ;;  %v46_v11 = vld [vmem:[#allocation3 + $0x10] sm:$0xff]  ;;  %v65_v13 = vld [vmem:[#allocation6 + $0x20] sm:$0xff]  ;;  %s205_s25 = scalar_lea.vmem %s148_s2, 2048  ;;  %p210_p11 = scmp.lt.s32.totalorder %s148_s2, %s148_s2 }
  0x1f   :  { %v94_v10 = vadd.f32 1.0, %v78_v2  ;;  %v81_v12 = vmul.f32 %v271_v0, %v64_v9  ;;  %v66_v14 = vld [vmem:[#allocation6 + $0x28] sm:$0xff]  ;;  %v95_v15 = vadd.f32 1.0, %v79_v7  ;;  %v47_v17 = vld [vmem:[#allocation3 + $0x18] sm:$0xff]  ;;  %v48_v18 = vld [vmem:[#allocation3 + $0x20] sm:$0xff]  ;;  %v82_v19 = vmul.f32 %v271_v0, %v65_v13  ;;  %p206_p10 = scmp.ne.s32.totalorder %s148_s2, %s205_s25  ;;  %p211_p12 = scmp.lt.s32.totalorder %s205_s25, %s205_s25 }
  0x20   :  { %v96_v16 = vadd.f32 1.0, %v80_v8  ;;  %v83_v20 = vmul.f32 %v271_v0, %v66_v14  ;;  %v67_v21 = vld [vmem:[#allocation6 + $0x30] sm:$0xff]  ;;  %v49_v24 = vld [vmem:[#allocation3 + $0x28] sm:$0xff]  ;;  %v68_v26 = vld [vmem:[#allocation6 + $0x38] sm:$0xff] }
  0x21   :  { %v110_v22 = vmul.f32 %v94_v10, %v44_v5  ;;  %v97_v23 = vadd.f32 1.0, %v81_v12  ;;  %v84_v25 = vmul.f32 %v271_v0, %v67_v21  ;;  %v69_v27 = vld [vmem:[#allocation6 + $0x40] sm:$0xff]  ;;  %v111_v28 = vmul.f32 %v95_v15, %v45_v6  ;;  %v50_v32 = vld [vmem:[#allocation3 + $0x30] sm:$0xff]  ;;  %v70_v33 = vld [vmem:[#allocation6 + $0x48] sm:$0xff]  ;;  %p212_p13 = por %p211_p12, %p210_p11 }
  0x22   :  { %v112_v29 = vmul.f32 %v96_v16, %v46_v11  ;;  %v98_v30 = vadd.f32 1.0, %v82_v19  ;;  %v99_v31 = vadd.f32 1.0, %v83_v20  ;;  %v51_v36 = vld [vmem:[#allocation3 + $0x38] sm:$0xff]  ;;  %v85_v37 = vmul.f32 %v271_v0, %v68_v26  ;;  %v71_v39 = vld [vmem:[#allocation6 + $0x50] sm:$0xff]  ;;  %v52_v43 = vld [vmem:[#allocation3 + $0x40] sm:$0xff] }
  0x23   :  { %126 = vst [vmem:[#allocation8] sm:$0xff] %v110_v22  ;;  %v113_v34 = vmul.f32 %v97_v23, %v47_v17  ;;  %v100_v35 = vadd.f32 1.0, %v84_v25  ;;  %v86_v38 = vmul.f32 %v271_v0, %v69_v27  ;;  %v72_v40 = vld [vmem:[#allocation6 + $0x58] sm:$0xff]  ;;  %127 = vst [vmem:[#allocation8 + $0x8] sm:$0xff] %v111_v28  ;;  %v53_v44 = vld [vmem:[#allocation3 + $0x48] sm:$0xff]  ;;  %v87_v45 = vmul.f32 %v271_v0, %v70_v33  ;;  %p213_p0 = pnand %p212_p13, %p206_p10 }
  0x24   :  { %128 = vst [vmem:[#allocation8 + $0x10] sm:$0xff] %v112_v29  ;;  %v114_v41 = vmul.f32 %v98_v30, %v48_v18  ;;  %v115_v42 = vmul.f32 %v99_v31, %v49_v24  ;;  %v88_v46 = vmul.f32 %v271_v0, %v71_v39  ;;  %v73_v47 = vld [vmem:[#allocation6 + $0x60] sm:$0xff]  ;;  %v101_v49 = vadd.f32 1.0, %v85_v37  ;;  %v54_v51 = vld [vmem:[#allocation3 + $0x50] sm:$0xff]  ;;  %v74_v53 = vld [vmem:[#allocation6 + $0x68] sm:$0xff] }
  0x25   :  { %129 = vst [vmem:[#allocation8 + $0x18] sm:$0xff] %v113_v34  ;;  %v116_v48 = vmul.f32 %v100_v35, %v50_v32  ;;  %v102_v50 = vadd.f32 1.0, %v86_v38  ;;  %v89_v52 = vmul.f32 %v271_v0, %v72_v40  ;;  %v75_v54 = vld [vmem:[#allocation6 + $0x70] sm:$0xff]  ;;  %v103_v55 = vadd.f32 1.0, %v87_v45  ;;  %v55_v57 = vld [vmem:[#allocation3 + $0x58] sm:$0xff]  ;;  %v56_v1 = vld [vmem:[#allocation3 + $0x60] sm:$0xff] }
  0x26   :  { %130 = vst [vmem:[#allocation8 + $0x20] sm:$0xff] %v114_v41  ;;  %131 = vst [vmem:[#allocation8 + $0x28] sm:$0xff] %v115_v42  ;;  %v104_v56 = vadd.f32 1.0, %v88_v46  ;;  %v90_v58 = vmul.f32 %v271_v0, %v73_v47  ;;  %v91_v59 = vmul.f32 %v271_v0, %v74_v53  ;;  %v76_v60 = vld [vmem:[#allocation6 + $0x78] sm:$0xff]  ;;  %v117_v61 = vmul.f32 %v101_v49, %v51_v36  ;;  %v57_v2 = vld [vmem:[#allocation3 + $0x68] sm:$0xff] }
  0x27   :  { %132 = vst [vmem:[#allocation8 + $0x30] sm:$0xff] %v116_v48  ;;  %v118_v62 = vmul.f32 %v102_v50, %v52_v43  ;;  %v105_v63 = vadd.f32 1.0, %v89_v52  ;;  %v92_v3 = vmul.f32 %v271_v0, %v75_v54  ;;  %v119_v4 = vmul.f32 %v103_v55, %v53_v44  ;;  %v58_v8 = vld [vmem:[#allocation3 + $0x70] sm:$0xff]  ;;  %v59_v14 = vld [vmem:[#allocation3 + $0x78] sm:$0xff] }
  0x28   :  { %v120_v5 = vmul.f32 %v104_v56, %v54_v51  ;;  %v106_v6 = vadd.f32 1.0, %v90_v58  ;;  %v107_v7 = vadd.f32 1.0, %v91_v59  ;;  %133 = vst [vmem:[#allocation8 + $0x38] sm:$0xff] %v117_v61  ;;  %v93_v11 = vmul.f32 %v271_v0, %v76_v60 }
  0x29   :  { %134 = vst [vmem:[#allocation8 + $0x40] sm:$0xff] %v118_v62  ;;  %v121_v9 = vmul.f32 %v105_v63, %v55_v57  ;;  %v108_v10 = vadd.f32 1.0, %v92_v3  ;;  %135 = vst [vmem:[#allocation8 + $0x48] sm:$0xff] %v119_v4 }
  0x2a   :  { %136 = vst [vmem:[#allocation8 + $0x50] sm:$0xff] %v120_v5  ;;  %v122_v12 = vmul.f32 %v106_v6, %v56_v1  ;;  %v123_v13 = vmul.f32 %v107_v7, %v57_v2  ;;  %v109_v16 = vadd.f32 1.0, %v93_v11 }
  0x2b   :  { %137 = vst [vmem:[#allocation8 + $0x58] sm:$0xff] %v121_v9  ;;  %v124_v15 = vmul.f32 %v108_v10, %v58_v8 }
  0x2c   :  { %138 = vst [vmem:[#allocation8 + $0x60] sm:$0xff] %v122_v12  ;;  %139 = vst [vmem:[#allocation8 + $0x68] sm:$0xff] %v123_v13  ;;  %v125_v17 = vmul.f32 %v109_v16, %v59_v14 }
  0x2d   :  { %140 = vst [vmem:[#allocation8 + $0x70] sm:$0xff] %v124_v15 }
  0x2e   :  { %141 = vst [vmem:[#allocation8 + $0x78] sm:$0xff] %v125_v17 }
  0x2f   :  { %216 = shalt.err (!%p213_p0)
}
  0x30   :  { %153 = dma.vmem_to_hbm [thread:$0]  %s148_s2, 2048, %s298_s3, [#allocation5], %s232_s15, %s232_s15, %s233_s16  }
  0x31   :  { %229 = dma.done.wait [#allocation5], 2048  }
  0x32   :  { %230 = vsyncadd [#allocation5], 4294965248 }
  0x33   :  { %157 = vsyncpa [#allocation4], 1 }
  0x34   :  { %158 = vsyncpa [#allocation7], 1 }
  0x35   :  { %159 = vsyncpa [#allocation5], 1 }

</bundles_post_ra>
